<compile_context>
chip_gen: v6e
topology: v6e:2x2x1
jax: 0.10.0
libtpu: 0.0.40
codegen_flags: <defaults>
</compile_context>

<pallas_src>
import functools
import math

import jax
import jax.numpy as jnp
from jax.experimental import pallas as pl
from jax.experimental.pallas import tpu as pltpu


def _flash_sdpa_kernel(q_ref, k_ref, v_ref, o_ref, m_sc, l_sc, acc_sc, *,
                       heads, scale, compute_dtype):
    """One (batch, q-tile, kv-tile) grid step; all heads processed per step.

    q_ref  : (tq, D)    queries (D = heads*dh, heads are contiguous D-slices)
    k_ref  : (tk, D)    keys
    v_ref  : (tk, D)    values
    o_ref  : (tq, D)    output (lane-dense, heads concatenated)
    m_sc   : (H, tq, 1) running row max             (f32 scratch)
    l_sc   : (H, tq, 1) running softmax denominator (f32 scratch)
    acc_sc : (H, tq, dh) running weighted-V sum     (f32 scratch)
    """
    kv_idx = pl.program_id(2)

    @pl.when(kv_idx == 0)
    def _():
        m_sc[...] = jnp.full_like(m_sc, -jnp.inf)
        l_sc[...] = jnp.zeros_like(l_sc)
        acc_sc[...] = jnp.zeros_like(acc_sc)

    D = q_ref.shape[-1]
    dh = D // heads

    q = q_ref[...]
    k = k_ref[...]
    v = v_ref[...]
    if compute_dtype is not None:
        q = q.astype(compute_dtype)
        k = k.astype(compute_dtype)
        v = v.astype(compute_dtype)
    # Fold the 1/sqrt(dh) scale into Q: tq*D multiplies instead of H*tq*tk.
    q = q * jnp.asarray(scale, dtype=q.dtype)

    for h in range(heads):                       # static unroll over heads
        sl = slice(h * dh, (h + 1) * dh)
        qh, kh, vh = q[:, sl], k[:, sl], v[:, sl]

        # scores = Qh @ Kh^T  (MXU, f32 accumulation)
        s = jax.lax.dot_general(
            qh, kh, (((1,), (1,)), ((), ())),
            preferred_element_type=jnp.float32)               # (tq, tk)

        m_prev = m_sc[h]                                       # (tq, 1)
        m_new = jnp.maximum(m_prev, jnp.max(s, axis=-1, keepdims=True))
        alpha = jnp.exp(m_prev - m_new)                        # rescale factor
        p = jnp.exp(s - m_new)                                 # (tq, tk) f32
        l_sc[h] = alpha * l_sc[h] + jnp.sum(p, axis=-1, keepdims=True)
        acc_sc[h] = alpha * acc_sc[h] + jnp.dot(
            p.astype(vh.dtype), vh, preferred_element_type=jnp.float32)
        m_sc[h] = m_new

    @pl.when(kv_idx == pl.num_programs(2) - 1)
    def _():
        # Normalize with an EUP approx reciprocal, concatenate heads in-kernel
        # and store lane-dense as (tq, D).
        outs = [acc_sc[h] * pl.reciprocal(l_sc[h], approx=True)
                for h in range(heads)]
        o_ref[...] = jnp.concatenate(outs, axis=-1).astype(o_ref.dtype)


def _pick_tile(dim, target):
    """Largest tile <= target that divides `dim` and is a multiple of 8 (or the
    full dim), so the second-minor block constraint is always satisfied."""
    t = min(target, dim)
    if dim % t == 0 and (t % 8 == 0 or t == dim):
        return t
    best = dim
    for c in range(8, min(target, dim) + 1, 8):
        if dim % c == 0:
            best = c
    return best


@functools.partial(
    jax.jit, static_argnames=("heads", "compute_dtype", "q_tile", "kv_tile"))
def scaled_dot_product_attention_block(query, key, value, *, heads=8,
                                       compute_dtype=None,
                                       q_tile=256, kv_tile=512):
    """query: (B, Sq, D), key/value: (B, Sk, D) -> (B, Sq, D).

    Matches the torch module: split D into `heads` chunks, per-head
    softmax(QK^T / sqrt(dh)) V, concat along D.  MXU operands use the input
    dtype (pass bf16 inputs for half the HBM traffic on v5e/v6e/v7x) or
    `compute_dtype` if given; softmax and accumulation stay f32.
    """
    B, Sq, D = query.shape
    Bk, Sk, Dk = key.shape
    assert D % heads == 0 and Dk == D and value.shape == key.shape and Bk == B
    dh = D // heads
    scale = 1.0 / math.sqrt(dh)

    tq = _pick_tile(Sq, q_tile)
    tk = _pick_tile(Sk, kv_tile)
    grid = (B, Sq // tq, Sk // tk)

    kernel = functools.partial(_flash_sdpa_kernel, heads=heads, scale=scale,
                               compute_dtype=compute_dtype)

    out_dtype = query.dtype
    cost = pl.CostEstimate(
        flops=4 * B * Sq * Sk * D,
        transcendentals=B * heads * Sq * Sk,
        bytes_accessed=(query.size * query.dtype.itemsize
                        + key.size * key.dtype.itemsize
                        + value.size * value.dtype.itemsize
                        + B * Sq * D * jnp.dtype(out_dtype).itemsize),
    )

    return pl.pallas_call(
        kernel,
        grid=grid,
        in_specs=[
            pl.BlockSpec((None, tq, D), lambda b, qi, ki: (b, qi, 0)),
            pl.BlockSpec((None, tk, D), lambda b, qi, ki: (b, ki, 0)),
            pl.BlockSpec((None, tk, D), lambda b, qi, ki: (b, ki, 0)),
        ],
        out_specs=pl.BlockSpec((None, tq, D), lambda b, qi, ki: (b, qi, 0)),
        out_shape=jax.ShapeDtypeStruct((B, Sq, D), out_dtype),
        scratch_shapes=[
            pltpu.VMEM((heads, tq, 1), jnp.float32),   # running max
            pltpu.VMEM((heads, tq, 1), jnp.float32),   # running denominator
            pltpu.VMEM((heads, tq, dh), jnp.float32),  # running output acc
        ],
        compiler_params=pltpu.CompilerParams(
            dimension_semantics=("parallel", "parallel", "arbitrary"),
            vmem_limit_bytes=32 * 1024 * 1024,
        ),
        cost_estimate=cost,
    )(query, key, value)


def sdpa_reference(query, key, value, heads=8):
    """Pure-JAX replica of the PyTorch forward (split / bmm / softmax / cat)."""
    B, Sq, D = query.shape
    dh = D // heads
    qf = query.astype(jnp.float32)
    kf = key.astype(jnp.float32)
    vf = value.astype(jnp.float32)
    outs = []
    for h in range(heads):
        sl = slice(h * dh, (h + 1) * dh)
        q, k, v = qf[..., sl], kf[..., sl], vf[..., sl]
        s = jnp.einsum('bqd,bkd->bqk', q, k) / math.sqrt(dh)
        p = jax.nn.softmax(s, axis=-1)
        outs.append(jnp.einsum('bqk,bkd->bqd', p, v))
    return jnp.concatenate(outs, axis=-1)


if __name__ == "__main__":
    # Small shapes consistent with the module: heads=8, D divisible by heads.
    B, S, D, heads = 2, 8, 32, 8
    root = jax.random.PRNGKey(0)
    kq, kk, kv = jax.random.split(root, 3)
    query = jax.random.normal(kq, (B, S, D), jnp.float32)
    key = jax.random.normal(kk, (B, S, D), jnp.float32)
    value = jax.random.normal(kv, (B, S, D), jnp.float32)

    out = scaled_dot_product_attention_block(query, key, value, heads=heads)
    out = jax.block_until_ready(out)
    ref = sdpa_reference(query, key, value, heads=heads)
    assert out.shape == (B, S, D)
    # Tolerance covers the EUP approx-reciprocal in the softmax denominator.
    assert jnp.allclose(out, ref, atol=5e-3, rtol=5e-3), \
        float(jnp.max(jnp.abs(out - ref)))

    # Multi-tile case: exercises the kv-tiled online-softmax recurrence
    # (grid = (2, 2, 2)) and the accumulator init/finalize via pl.when.
    B2, S2, D2 = 2, 256, 256
    kq2, kk2, kv2 = jax.random.split(jax.random.PRNGKey(0), 3)
    q2 = jax.random.normal(kq2, (B2, S2, D2), jnp.float32)
    k2 = jax.random.normal(kk2, (B2, S2, D2), jnp.float32)
    v2 = jax.random.normal(kv2, (B2, S2, D2), jnp.float32)
    out2 = scaled_dot_product_attention_block(q2, k2, v2, heads=heads,
                                              q_tile=128, kv_tile=128)
    out2 = jax.block_until_ready(out2)
    ref2 = sdpa_reference(q2, k2, v2, heads=heads)
    assert jnp.allclose(out2, ref2, atol=5e-3, rtol=5e-3), \
        float(jnp.max(jnp.abs(out2 - ref2)))

    # bf16-operand path: bf16 in -> bf16 out, matmul operands bf16,
    # softmax/accumulation f32 (valid on v5e / v6e / v7x).
    qb, kb, vb = (x.astype(jnp.bfloat16) for x in (query, key, value))
    out_bf = scaled_dot_product_attention_block(qb, kb, vb, heads=heads)
    out_bf = jax.block_until_ready(out_bf)
    assert out_bf.dtype == jnp.bfloat16
    ref_bf = sdpa_reference(qb, kb, vb, heads=heads)
    assert jnp.allclose(out_bf.astype(jnp.float32), ref_bf,
                        atol=5e-2, rtol=5e-2)

    print("KERNEL_OK")
</pallas_src>

<mosaic_0001>
module attributes {stable_mosaic.version = 11 : i64} {
  func.func @_flash_sdpa_kernel(%arg0: i32, %arg1: i32, %arg2: i32, %arg3: memref<1x8x32xf32, #tpu.memory_space<vmem>>, %arg4: memref<1x8x32xf32, #tpu.memory_space<vmem>>, %arg5: memref<1x8x32xf32, #tpu.memory_space<vmem>>, %arg6: memref<1x8x32xf32, #tpu.memory_space<vmem>>, %arg7: memref<8x8x1xf32, #tpu.memory_space<vmem>>, %arg8: memref<8x8x1xf32, #tpu.memory_space<vmem>>, %arg9: memref<8x8x4xf32, #tpu.memory_space<vmem>>) attributes {dimension_semantics = [#tpu.dimension_semantics<parallel>, #tpu.dimension_semantics<parallel>, #tpu.dimension_semantics<arbitrary>], iteration_bounds = array<i64: 2, 1, 1>, scalar_prefetch = 0 : i64, scratch_operands = 3 : i64, tpu.core_type = #tpu.core_type<tc>, window_params = [{transform_indices = @transform_0, window_bounds = array<i64: 1, 8, 32>}, {transform_indices = @transform_1, window_bounds = array<i64: 1, 8, 32>}, {transform_indices = @transform_2, window_bounds = array<i64: 1, 8, 32>}, {transform_indices = @transform_3, window_bounds = array<i64: 1, 8, 32>}]} {
    %c0_i32 = arith.constant 0 : i32
    %0 = arith.cmpi eq, %arg2, %c0_i32 : i32
    %1 = arith.extui %0 : i1 to i32
    %c0_i32_0 = arith.constant 0 : i32
    %2 = arith.cmpi ne, %1, %c0_i32_0 : i32
    scf.if %2 {
      %cst_180 = arith.constant 0xFF800000 : f32
      %294 = vector.broadcast %cst_180 : f32 to vector<8x8x1xf32>
      %c0_181 = arith.constant 0 : index
      %c0_182 = arith.constant 0 : index
      %c0_183 = arith.constant 0 : index
      %295 = vector.load %arg7[%c0_181, %c0_182, %c0_183] : memref<8x8x1xf32, #tpu.memory_space<vmem>>, vector<8x8x1xf32>
      tpu.vector_store %arg7[%c0_181, %c0_182, %c0_183], %294 {strides = array<i32>} : memref<8x8x1xf32, #tpu.memory_space<vmem>>, vector<8x8x1xf32>,
      %cst_184 = arith.constant 0.000000e+00 : f32
      %296 = vector.broadcast %cst_184 : f32 to vector<8x8x1xf32>
      %c0_185 = arith.constant 0 : index
      %c0_186 = arith.constant 0 : index
      %c0_187 = arith.constant 0 : index
      %297 = vector.load %arg8[%c0_185, %c0_186, %c0_187] : memref<8x8x1xf32, #tpu.memory_space<vmem>>, vector<8x8x1xf32>
      tpu.vector_store %arg8[%c0_185, %c0_186, %c0_187], %296 {strides = array<i32>} : memref<8x8x1xf32, #tpu.memory_space<vmem>>, vector<8x8x1xf32>,
      %cst_188 = arith.constant 0.000000e+00 : f32
      %298 = vector.broadcast %cst_188 : f32 to vector<8x8x4xf32>
      %c0_189 = arith.constant 0 : index
      %c0_190 = arith.constant 0 : index
      %c0_191 = arith.constant 0 : index
      %299 = vector.load %arg9[%c0_189, %c0_190, %c0_191] : memref<8x8x4xf32, #tpu.memory_space<vmem>>, vector<8x8x4xf32>
      tpu.vector_store %arg9[%c0_189, %c0_190, %c0_191], %298 {strides = array<i32>} : memref<8x8x4xf32, #tpu.memory_space<vmem>>, vector<8x8x4xf32>,
    } else {
    }
    %c0 = arith.constant 0 : index
    %c0_1 = arith.constant 0 : index
    %c0_2 = arith.constant 0 : index
    %3 = vector.load %arg3[%c0, %c0_1, %c0_2] : memref<1x8x32xf32, #tpu.memory_space<vmem>>, vector<1x8x32xf32>
    %4 = vector.shape_cast %3 : vector<1x8x32xf32> to vector<8x32xf32>
    %c0_3 = arith.constant 0 : index
    %c0_4 = arith.constant 0 : index
    %c0_5 = arith.constant 0 : index
    %5 = vector.load %arg4[%c0_3, %c0_4, %c0_5] : memref<1x8x32xf32, #tpu.memory_space<vmem>>, vector<1x8x32xf32>
    %6 = vector.shape_cast %5 : vector<1x8x32xf32> to vector<8x32xf32>
    %c0_6 = arith.constant 0 : index
    %c0_7 = arith.constant 0 : index
    %c0_8 = arith.constant 0 : index
    %7 = vector.load %arg5[%c0_6, %c0_7, %c0_8] : memref<1x8x32xf32, #tpu.memory_space<vmem>>, vector<1x8x32xf32>
    %8 = vector.shape_cast %7 : vector<1x8x32xf32> to vector<8x32xf32>
    %cst = arith.constant 5.000000e-01 : f32
    %9 = vector.broadcast %cst : f32 to vector<8x32xf32>
    %10 = arith.mulf %4, %9 : vector<8x32xf32>
    %11 = vector.extract_strided_slice %10 {offsets = [0, 0], sizes = [8, 4], strides = [1, 1]} : vector<8x32xf32> to vector<8x4xf32>
    %12 = vector.extract_strided_slice %6 {offsets = [0, 0], sizes = [8, 4], strides = [1, 1]} : vector<8x32xf32> to vector<8x4xf32>
    %13 = vector.extract_strided_slice %8 {offsets = [0, 0], sizes = [8, 4], strides = [1, 1]} : vector<8x32xf32> to vector<8x4xf32>
    %cst_9 = arith.constant dense<0.000000e+00> : vector<8x8xf32>
    %14 = tpu.matmul %11, %12, %cst_9 {dimension_numbers = #tpu.dot_dimension_numbers<[1], [1], [0], [0], [0, 0, 1, 0], [], []>} : vector<8x4xf32>, vector<8x4xf32>, vector<8x8xf32> -> vector<8x8xf32>
    %c0_10 = arith.constant 0 : index
    %c0_11 = arith.constant 0 : index
    %c0_12 = arith.constant 0 : index
    %15 = vector.load %arg7[%c0_10, %c0_11, %c0_12] : memref<8x8x1xf32, #tpu.memory_space<vmem>>, vector<1x8x1xf32>
    %16 = vector.shape_cast %15 : vector<1x8x1xf32> to vector<8x1xf32>
    %cst_13 = arith.constant dense<0xFF800000> : vector<8xf32>
    %17 = vector.multi_reduction <maximumf>, %14, %cst_13 [1] : vector<8x8xf32> to vector<8xf32>
    %18 = vector.shape_cast %17 : vector<8xf32> to vector<8x1xf32>
    %19 = arith.maximumf %16, %18 : vector<8x1xf32>
    %20 = arith.subf %16, %19 : vector<8x1xf32>
    %21 = math.exp %20 : vector<8x1xf32>
    %22 = vector.broadcast %19 : vector<8x1xf32> to vector<8x8xf32>
    %23 = arith.subf %14, %22 : vector<8x8xf32>
    %24 = math.exp %23 : vector<8x8xf32>
    %c0_14 = arith.constant 0 : index
    %c0_15 = arith.constant 0 : index
    %c0_16 = arith.constant 0 : index
    %25 = vector.load %arg8[%c0_14, %c0_15, %c0_16] : memref<8x8x1xf32, #tpu.memory_space<vmem>>, vector<1x8x1xf32>
    %26 = vector.shape_cast %25 : vector<1x8x1xf32> to vector<8x1xf32>
    %27 = arith.mulf %21, %26 : vector<8x1xf32>
    %cst_17 = arith.constant dense<0.000000e+00> : vector<8xf32>
    %28 = vector.multi_reduction <add>, %24, %cst_17 [1] : vector<8x8xf32> to vector<8xf32>
    %29 = vector.shape_cast %28 : vector<8xf32> to vector<8x1xf32>
    %30 = arith.addf %27, %29 : vector<8x1xf32>
    %c0_18 = arith.constant 0 : index
    %c0_19 = arith.constant 0 : index
    %c0_20 = arith.constant 0 : index
    %31 = vector.load %arg8[%c0_18, %c0_19, %c0_20] : memref<8x8x1xf32, #tpu.memory_space<vmem>>, vector<1x8x1xf32>
    %32 = vector.shape_cast %31 : vector<1x8x1xf32> to vector<8x1xf32>
    %33 = vector.shape_cast %30 : vector<8x1xf32> to vector<1x8x1xf32>
    tpu.vector_store %arg8[%c0_18, %c0_19, %c0_20], %33 {strides = array<i32>} : memref<8x8x1xf32, #tpu.memory_space<vmem>>, vector<1x8x1xf32>,
    %c0_21 = arith.constant 0 : index
    %c0_22 = arith.constant 0 : index
    %c0_23 = arith.constant 0 : index
    %34 = vector.load %arg9[%c0_21, %c0_22, %c0_23] : memref<8x8x4xf32, #tpu.memory_space<vmem>>, vector<1x8x4xf32>
    %35 = vector.shape_cast %34 : vector<1x8x4xf32> to vector<8x4xf32>
    %36 = vector.broadcast %21 : vector<8x1xf32> to vector<8x4xf32>
    %37 = arith.mulf %36, %35 : vector<8x4xf32>
    %cst_24 = arith.constant dense<0.000000e+00> : vector<8x4xf32>
    %38 = tpu.matmul %24, %13, %cst_24 {dimension_numbers = #tpu.dot_dimension_numbers<[1], [0], [0], [1], [0, 0, 1, 1], [], []>} : vector<8x8xf32>, vector<8x4xf32>, vector<8x4xf32> -> vector<8x4xf32>
    %39 = arith.addf %37, %38 : vector<8x4xf32>
    %c0_25 = arith.constant 0 : index
    %c0_26 = arith.constant 0 : index
    %c0_27 = arith.constant 0 : index
    %40 = vector.load %arg9[%c0_25, %c0_26, %c0_27] : memref<8x8x4xf32, #tpu.memory_space<vmem>>, vector<1x8x4xf32>
    %41 = vector.shape_cast %40 : vector<1x8x4xf32> to vector<8x4xf32>
    %42 = vector.shape_cast %39 : vector<8x4xf32> to vector<1x8x4xf32>
    tpu.vector_store %arg9[%c0_25, %c0_26, %c0_27], %42 {strides = array<i32>} : memref<8x8x4xf32, #tpu.memory_space<vmem>>, vector<1x8x4xf32>,
    %c0_28 = arith.constant 0 : index
    %c0_29 = arith.constant 0 : index
    %c0_30 = arith.constant 0 : index
    %43 = vector.load %arg7[%c0_28, %c0_29, %c0_30] : memref<8x8x1xf32, #tpu.memory_space<vmem>>, vector<1x8x1xf32>
    %44 = vector.shape_cast %43 : vector<1x8x1xf32> to vector<8x1xf32>
    %45 = vector.shape_cast %19 : vector<8x1xf32> to vector<1x8x1xf32>
    tpu.vector_store %arg7[%c0_28, %c0_29, %c0_30], %45 {strides = array<i32>} : memref<8x8x1xf32, #tpu.memory_space<vmem>>, vector<1x8x1xf32>,
    %46 = vector.extract_strided_slice %10 {offsets = [0, 4], sizes = [8, 4], strides = [1, 1]} : vector<8x32xf32> to vector<8x4xf32>
    %47 = vector.extract_strided_slice %6 {offsets = [0, 4], sizes = [8, 4], strides = [1, 1]} : vector<8x32xf32> to vector<8x4xf32>
    %48 = vector.extract_strided_slice %8 {offsets = [0, 4], sizes = [8, 4], strides = [1, 1]} : vector<8x32xf32> to vector<8x4xf32>
    %cst_31 = arith.constant dense<0.000000e+00> : vector<8x8xf32>
    %49 = tpu.matmul %46, %47, %cst_31 {dimension_numbers = #tpu.dot_dimension_numbers<[1], [1], [0], [0], [0, 0, 1, 0], [], []>} : vector<8x4xf32>, vector<8x4xf32>, vector<8x8xf32> -> vector<8x8xf32>
    %c1 = arith.constant 1 : index
    %c0_32 = arith.constant 0 : index
    %c0_33 = arith.constant 0 : index
    %50 = vector.load %arg7[%c1, %c0_32, %c0_33] : memref<8x8x1xf32, #tpu.memory_space<vmem>>, vector<1x8x1xf32>
    %51 = vector.shape_cast %50 : vector<1x8x1xf32> to vector<8x1xf32>
    %cst_34 = arith.constant dense<0xFF800000> : vector<8xf32>
    %52 = vector.multi_reduction <maximumf>, %49, %cst_34 [1] : vector<8x8xf32> to vector<8xf32>
    %53 = vector.shape_cast %52 : vector<8xf32> to vector<8x1xf32>
    %54 = arith.maximumf %51, %53 : vector<8x1xf32>
    %55 = arith.subf %51, %54 : vector<8x1xf32>
    %56 = math.exp %55 : vector<8x1xf32>
    %57 = vector.broadcast %54 : vector<8x1xf32> to vector<8x8xf32>
    %58 = arith.subf %49, %57 : vector<8x8xf32>
    %59 = math.exp %58 : vector<8x8xf32>
    %c1_35 = arith.constant 1 : index
    %c0_36 = arith.constant 0 : index
    %c0_37 = arith.constant 0 : index
    %60 = vector.load %arg8[%c1_35, %c0_36, %c0_37] : memref<8x8x1xf32, #tpu.memory_space<vmem>>, vector<1x8x1xf32>
    %61 = vector.shape_cast %60 : vector<1x8x1xf32> to vector<8x1xf32>
    %62 = arith.mulf %56, %61 : vector<8x1xf32>
    %cst_38 = arith.constant dense<0.000000e+00> : vector<8xf32>
    %63 = vector.multi_reduction <add>, %59, %cst_38 [1] : vector<8x8xf32> to vector<8xf32>
    %64 = vector.shape_cast %63 : vector<8xf32> to vector<8x1xf32>
    %65 = arith.addf %62, %64 : vector<8x1xf32>
    %c1_39 = arith.constant 1 : index
    %c0_40 = arith.constant 0 : index
    %c0_41 = arith.constant 0 : index
    %66 = vector.load %arg8[%c1_39, %c0_40, %c0_41] : memref<8x8x1xf32, #tpu.memory_space<vmem>>, vector<1x8x1xf32>
    %67 = vector.shape_cast %66 : vector<1x8x1xf32> to vector<8x1xf32>
    %68 = vector.shape_cast %65 : vector<8x1xf32> to vector<1x8x1xf32>
    tpu.vector_store %arg8[%c1_39, %c0_40, %c0_41], %68 {strides = array<i32>} : memref<8x8x1xf32, #tpu.memory_space<vmem>>, vector<1x8x1xf32>,
    %c1_42 = arith.constant 1 : index
    %c0_43 = arith.constant 0 : index
    %c0_44 = arith.constant 0 : index
    %69 = vector.load %arg9[%c1_42, %c0_43, %c0_44] : memref<8x8x4xf32, #tpu.memory_space<vmem>>, vector<1x8x4xf32>
    %70 = vector.shape_cast %69 : vector<1x8x4xf32> to vector<8x4xf32>
    %71 = vector.broadcast %56 : vector<8x1xf32> to vector<8x4xf32>
    %72 = arith.mulf %71, %70 : vector<8x4xf32>
    %cst_45 = arith.constant dense<0.000000e+00> : vector<8x4xf32>
    %73 = tpu.matmul %59, %48, %cst_45 {dimension_numbers = #tpu.dot_dimension_numbers<[1], [0], [0], [1], [0, 0, 1, 1], [], []>} : vector<8x8xf32>, vector<8x4xf32>, vector<8x4xf32> -> vector<8x4xf32>
    %74 = arith.addf %72, %73 : vector<8x4xf32>
    %c1_46 = arith.constant 1 : index
    %c0_47 = arith.constant 0 : index
    %c0_48 = arith.constant 0 : index
    %75 = vector.load %arg9[%c1_46, %c0_47, %c0_48] : memref<8x8x4xf32, #tpu.memory_space<vmem>>, vector<1x8x4xf32>
    %76 = vector.shape_cast %75 : vector<1x8x4xf32> to vector<8x4xf32>
    %77 = vector.shape_cast %74 : vector<8x4xf32> to vector<1x8x4xf32>
    tpu.vector_store %arg9[%c1_46, %c0_47, %c0_48], %77 {strides = array<i32>} : memref<8x8x4xf32, #tpu.memory_space<vmem>>, vector<1x8x4xf32>,
    %c1_49 = arith.constant 1 : index
    %c0_50 = arith.constant 0 : index
    %c0_51 = arith.constant 0 : index
    %78 = vector.load %arg7[%c1_49, %c0_50, %c0_51] : memref<8x8x1xf32, #tpu.memory_space<vmem>>, vector<1x8x1xf32>
    %79 = vector.shape_cast %78 : vector<1x8x1xf32> to vector<8x1xf32>
    %80 = vector.shape_cast %54 : vector<8x1xf32> to vector<1x8x1xf32>
    tpu.vector_store %arg7[%c1_49, %c0_50, %c0_51], %80 {strides = array<i32>} : memref<8x8x1xf32, #tpu.memory_space<vmem>>, vector<1x8x1xf32>,
    %81 = vector.extract_strided_slice %10 {offsets = [0, 8], sizes = [8, 4], strides = [1, 1]} : vector<8x32xf32> to vector<8x4xf32>
    %82 = vector.extract_strided_slice %6 {offsets = [0, 8], sizes = [8, 4], strides = [1, 1]} : vector<8x32xf32> to vector<8x4xf32>
    %83 = vector.extract_strided_slice %8 {offsets = [0, 8], sizes = [8, 4], strides = [1, 1]} : vector<8x32xf32> to vector<8x4xf32>
    %cst_52 = arith.constant dense<0.000000e+00> : vector<8x8xf32>
    %84 = tpu.matmul %81, %82, %cst_52 {dimension_numbers = #tpu.dot_dimension_numbers<[1], [1], [0], [0], [0, 0, 1, 0], [], []>} : vector<8x4xf32>, vector<8x4xf32>, vector<8x8xf32> -> vector<8x8xf32>
    %c2 = arith.constant 2 : index
    %c0_53 = arith.constant 0 : index
    %c0_54 = arith.constant 0 : index
    %85 = vector.load %arg7[%c2, %c0_53, %c0_54] : memref<8x8x1xf32, #tpu.memory_space<vmem>>, vector<1x8x1xf32>
    %86 = vector.shape_cast %85 : vector<1x8x1xf32> to vector<8x1xf32>
    %cst_55 = arith.constant dense<0xFF800000> : vector<8xf32>
    %87 = vector.multi_reduction <maximumf>, %84, %cst_55 [1] : vector<8x8xf32> to vector<8xf32>
    %88 = vector.shape_cast %87 : vector<8xf32> to vector<8x1xf32>
    %89 = arith.maximumf %86, %88 : vector<8x1xf32>
    %90 = arith.subf %86, %89 : vector<8x1xf32>
    %91 = math.exp %90 : vector<8x1xf32>
    %92 = vector.broadcast %89 : vector<8x1xf32> to vector<8x8xf32>
    %93 = arith.subf %84, %92 : vector<8x8xf32>
    %94 = math.exp %93 : vector<8x8xf32>
    %c2_56 = arith.constant 2 : index
    %c0_57 = arith.constant 0 : index
    %c0_58 = arith.constant 0 : index
    %95 = vector.load %arg8[%c2_56, %c0_57, %c0_58] : memref<8x8x1xf32, #tpu.memory_space<vmem>>, vector<1x8x1xf32>
    %96 = vector.shape_cast %95 : vector<1x8x1xf32> to vector<8x1xf32>
    %97 = arith.mulf %91, %96 : vector<8x1xf32>
    %cst_59 = arith.constant dense<0.000000e+00> : vector<8xf32>
    %98 = vector.multi_reduction <add>, %94, %cst_59 [1] : vector<8x8xf32> to vector<8xf32>
    %99 = vector.shape_cast %98 : vector<8xf32> to vector<8x1xf32>
    %100 = arith.addf %97, %99 : vector<8x1xf32>
    %c2_60 = arith.constant 2 : index
    %c0_61 = arith.constant 0 : index
    %c0_62 = arith.constant 0 : index
    %101 = vector.load %arg8[%c2_60, %c0_61, %c0_62] : memref<8x8x1xf32, #tpu.memory_space<vmem>>, vector<1x8x1xf32>
    %102 = vector.shape_cast %101 : vector<1x8x1xf32> to vector<8x1xf32>
    %103 = vector.shape_cast %100 : vector<8x1xf32> to vector<1x8x1xf32>
    tpu.vector_store %arg8[%c2_60, %c0_61, %c0_62], %103 {strides = array<i32>} : memref<8x8x1xf32, #tpu.memory_space<vmem>>, vector<1x8x1xf32>,
    %c2_63 = arith.constant 2 : index
    %c0_64 = arith.constant 0 : index
    %c0_65 = arith.constant 0 : index
    %104 = vector.load %arg9[%c2_63, %c0_64, %c0_65] : memref<8x8x4xf32, #tpu.memory_space<vmem>>, vector<1x8x4xf32>
    %105 = vector.shape_cast %104 : vector<1x8x4xf32> to vector<8x4xf32>
    %106 = vector.broadcast %91 : vector<8x1xf32> to vector<8x4xf32>
    %107 = arith.mulf %106, %105 : vector<8x4xf32>
    %cst_66 = arith.constant dense<0.000000e+00> : vector<8x4xf32>
    %108 = tpu.matmul %94, %83, %cst_66 {dimension_numbers = #tpu.dot_dimension_numbers<[1], [0], [0], [1], [0, 0, 1, 1], [], []>} : vector<8x8xf32>, vector<8x4xf32>, vector<8x4xf32> -> vector<8x4xf32>
    %109 = arith.addf %107, %108 : vector<8x4xf32>
    %c2_67 = arith.constant 2 : index
    %c0_68 = arith.constant 0 : index
    %c0_69 = arith.constant 0 : index
    %110 = vector.load %arg9[%c2_67, %c0_68, %c0_69] : memref<8x8x4xf32, #tpu.memory_space<vmem>>, vector<1x8x4xf32>
    %111 = vector.shape_cast %110 : vector<1x8x4xf32> to vector<8x4xf32>
    %112 = vector.shape_cast %109 : vector<8x4xf32> to vector<1x8x4xf32>
    tpu.vector_store %arg9[%c2_67, %c0_68, %c0_69], %112 {strides = array<i32>} : memref<8x8x4xf32, #tpu.memory_space<vmem>>, vector<1x8x4xf32>,
    %c2_70 = arith.constant 2 : index
    %c0_71 = arith.constant 0 : index
    %c0_72 = arith.constant 0 : index
    %113 = vector.load %arg7[%c2_70, %c0_71, %c0_72] : memref<8x8x1xf32, #tpu.memory_space<vmem>>, vector<1x8x1xf32>
    %114 = vector.shape_cast %113 : vector<1x8x1xf32> to vector<8x1xf32>
    %115 = vector.shape_cast %89 : vector<8x1xf32> to vector<1x8x1xf32>
    tpu.vector_store %arg7[%c2_70, %c0_71, %c0_72], %115 {strides = array<i32>} : memref<8x8x1xf32, #tpu.memory_space<vmem>>, vector<1x8x1xf32>,
    %116 = vector.extract_strided_slice %10 {offsets = [0, 12], sizes = [8, 4], strides = [1, 1]} : vector<8x32xf32> to vector<8x4xf32>
    %117 = vector.extract_strided_slice %6 {offsets = [0, 12], sizes = [8, 4], strides = [1, 1]} : vector<8x32xf32> to vector<8x4xf32>
    %118 = vector.extract_strided_slice %8 {offsets = [0, 12], sizes = [8, 4], strides = [1, 1]} : vector<8x32xf32> to vector<8x4xf32>
    %cst_73 = arith.constant dense<0.000000e+00> : vector<8x8xf32>
    %119 = tpu.matmul %116, %117, %cst_73 {dimension_numbers = #tpu.dot_dimension_numbers<[1], [1], [0], [0], [0, 0, 1, 0], [], []>} : vector<8x4xf32>, vector<8x4xf32>, vector<8x8xf32> -> vector<8x8xf32>
    %c3 = arith.constant 3 : index
    %c0_74 = arith.constant 0 : index
    %c0_75 = arith.constant 0 : index
    %120 = vector.load %arg7[%c3, %c0_74, %c0_75] : memref<8x8x1xf32, #tpu.memory_space<vmem>>, vector<1x8x1xf32>
    %121 = vector.shape_cast %120 : vector<1x8x1xf32> to vector<8x1xf32>
    %cst_76 = arith.constant dense<0xFF800000> : vector<8xf32>
    %122 = vector.multi_reduction <maximumf>, %119, %cst_76 [1] : vector<8x8xf32> to vector<8xf32>
    %123 = vector.shape_cast %122 : vector<8xf32> to vector<8x1xf32>
    %124 = arith.maximumf %121, %123 : vector<8x1xf32>
    %125 = arith.subf %121, %124 : vector<8x1xf32>
    %126 = math.exp %125 : vector<8x1xf32>
    %127 = vector.broadcast %124 : vector<8x1xf32> to vector<8x8xf32>
    %128 = arith.subf %119, %127 : vector<8x8xf32>
    %129 = math.exp %128 : vector<8x8xf32>
    %c3_77 = arith.constant 3 : index
    %c0_78 = arith.constant 0 : index
    %c0_79 = arith.constant 0 : index
    %130 = vector.load %arg8[%c3_77, %c0_78, %c0_79] : memref<8x8x1xf32, #tpu.memory_space<vmem>>, vector<1x8x1xf32>
    %131 = vector.shape_cast %130 : vector<1x8x1xf32> to vector<8x1xf32>
    %132 = arith.mulf %126, %131 : vector<8x1xf32>
    %cst_80 = arith.constant dense<0.000000e+00> : vector<8xf32>
    %133 = vector.multi_reduction <add>, %129, %cst_80 [1] : vector<8x8xf32> to vector<8xf32>
    %134 = vector.shape_cast %133 : vector<8xf32> to vector<8x1xf32>
    %135 = arith.addf %132, %134 : vector<8x1xf32>
    %c3_81 = arith.constant 3 : index
    %c0_82 = arith.constant 0 : index
    %c0_83 = arith.constant 0 : index
    %136 = vector.load %arg8[%c3_81, %c0_82, %c0_83] : memref<8x8x1xf32, #tpu.memory_space<vmem>>, vector<1x8x1xf32>
    %137 = vector.shape_cast %136 : vector<1x8x1xf32> to vector<8x1xf32>
    %138 = vector.shape_cast %135 : vector<8x1xf32> to vector<1x8x1xf32>
    tpu.vector_store %arg8[%c3_81, %c0_82, %c0_83], %138 {strides = array<i32>} : memref<8x8x1xf32, #tpu.memory_space<vmem>>, vector<1x8x1xf32>,
    %c3_84 = arith.constant 3 : index
    %c0_85 = arith.constant 0 : index
    %c0_86 = arith.constant 0 : index
    %139 = vector.load %arg9[%c3_84, %c0_85, %c0_86] : memref<8x8x4xf32, #tpu.memory_space<vmem>>, vector<1x8x4xf32>
    %140 = vector.shape_cast %139 : vector<1x8x4xf32> to vector<8x4xf32>
    %141 = vector.broadcast %126 : vector<8x1xf32> to vector<8x4xf32>
    %142 = arith.mulf %141, %140 : vector<8x4xf32>
    %cst_87 = arith.constant dense<0.000000e+00> : vector<8x4xf32>
    %143 = tpu.matmul %129, %118, %cst_87 {dimension_numbers = #tpu.dot_dimension_numbers<[1], [0], [0], [1], [0, 0, 1, 1], [], []>} : vector<8x8xf32>, vector<8x4xf32>, vector<8x4xf32> -> vector<8x4xf32>
    %144 = arith.addf %142, %143 : vector<8x4xf32>
    %c3_88 = arith.constant 3 : index
    %c0_89 = arith.constant 0 : index
    %c0_90 = arith.constant 0 : index
    %145 = vector.load %arg9[%c3_88, %c0_89, %c0_90] : memref<8x8x4xf32, #tpu.memory_space<vmem>>, vector<1x8x4xf32>
    %146 = vector.shape_cast %145 : vector<1x8x4xf32> to vector<8x4xf32>
    %147 = vector.shape_cast %144 : vector<8x4xf32> to vector<1x8x4xf32>
    tpu.vector_store %arg9[%c3_88, %c0_89, %c0_90], %147 {strides = array<i32>} : memref<8x8x4xf32, #tpu.memory_space<vmem>>, vector<1x8x4xf32>,
    %c3_91 = arith.constant 3 : index
    %c0_92 = arith.constant 0 : index
    %c0_93 = arith.constant 0 : index
    %148 = vector.load %arg7[%c3_91, %c0_92, %c0_93] : memref<8x8x1xf32, #tpu.memory_space<vmem>>, vector<1x8x1xf32>
    %149 = vector.shape_cast %148 : vector<1x8x1xf32> to vector<8x1xf32>
    %150 = vector.shape_cast %124 : vector<8x1xf32> to vector<1x8x1xf32>
    tpu.vector_store %arg7[%c3_91, %c0_92, %c0_93], %150 {strides = array<i32>} : memref<8x8x1xf32, #tpu.memory_space<vmem>>, vector<1x8x1xf32>,
    %151 = vector.extract_strided_slice %10 {offsets = [0, 16], sizes = [8, 4], strides = [1, 1]} : vector<8x32xf32> to vector<8x4xf32>
    %152 = vector.extract_strided_slice %6 {offsets = [0, 16], sizes = [8, 4], strides = [1, 1]} : vector<8x32xf32> to vector<8x4xf32>
    %153 = vector.extract_strided_slice %8 {offsets = [0, 16], sizes = [8, 4], strides = [1, 1]} : vector<8x32xf32> to vector<8x4xf32>
    %cst_94 = arith.constant dense<0.000000e+00> : vector<8x8xf32>
    %154 = tpu.matmul %151, %152, %cst_94 {dimension_numbers = #tpu.dot_dimension_numbers<[1], [1], [0], [0], [0, 0, 1, 0], [], []>} : vector<8x4xf32>, vector<8x4xf32>, vector<8x8xf32> -> vector<8x8xf32>
    %c4 = arith.constant 4 : index
    %c0_95 = arith.constant 0 : index
    %c0_96 = arith.constant 0 : index
    %155 = vector.load %arg7[%c4, %c0_95, %c0_96] : memref<8x8x1xf32, #tpu.memory_space<vmem>>, vector<1x8x1xf32>
    %156 = vector.shape_cast %155 : vector<1x8x1xf32> to vector<8x1xf32>
    %cst_97 = arith.constant dense<0xFF800000> : vector<8xf32>
    %157 = vector.multi_reduction <maximumf>, %154, %cst_97 [1] : vector<8x8xf32> to vector<8xf32>
    %158 = vector.shape_cast %157 : vector<8xf32> to vector<8x1xf32>
    %159 = arith.maximumf %156, %158 : vector<8x1xf32>
    %160 = arith.subf %156, %159 : vector<8x1xf32>
    %161 = math.exp %160 : vector<8x1xf32>
    %162 = vector.broadcast %159 : vector<8x1xf32> to vector<8x8xf32>
    %163 = arith.subf %154, %162 : vector<8x8xf32>
    %164 = math.exp %163 : vector<8x8xf32>
    %c4_98 = arith.constant 4 : index
    %c0_99 = arith.constant 0 : index
    %c0_100 = arith.constant 0 : index
    %165 = vector.load %arg8[%c4_98, %c0_99, %c0_100] : memref<8x8x1xf32, #tpu.memory_space<vmem>>, vector<1x8x1xf32>
    %166 = vector.shape_cast %165 : vector<1x8x1xf32> to vector<8x1xf32>
    %167 = arith.mulf %161, %166 : vector<8x1xf32>
    %cst_101 = arith.constant dense<0.000000e+00> : vector<8xf32>
    %168 = vector.multi_reduction <add>, %164, %cst_101 [1] : vector<8x8xf32> to vector<8xf32>
    %169 = vector.shape_cast %168 : vector<8xf32> to vector<8x1xf32>
    %170 = arith.addf %167, %169 : vector<8x1xf32>
    %c4_102 = arith.constant 4 : index
    %c0_103 = arith.constant 0 : index
    %c0_104 = arith.constant 0 : index
    %171 = vector.load %arg8[%c4_102, %c0_103, %c0_104] : memref<8x8x1xf32, #tpu.memory_space<vmem>>, vector<1x8x1xf32>
    %172 = vector.shape_cast %171 : vector<1x8x1xf32> to vector<8x1xf32>
    %173 = vector.shape_cast %170 : vector<8x1xf32> to vector<1x8x1xf32>
    tpu.vector_store %arg8[%c4_102, %c0_103, %c0_104], %173 {strides = array<i32>} : memref<8x8x1xf32, #tpu.memory_space<vmem>>, vector<1x8x1xf32>,
    %c4_105 = arith.constant 4 : index
    %c0_106 = arith.constant 0 : index
    %c0_107 = arith.constant 0 : index
    %174 = vector.load %arg9[%c4_105, %c0_106, %c0_107] : memref<8x8x4xf32, #tpu.memory_space<vmem>>, vector<1x8x4xf32>
    %175 = vector.shape_cast %174 : vector<1x8x4xf32> to vector<8x4xf32>
    %176 = vector.broadcast %161 : vector<8x1xf32> to vector<8x4xf32>
    %177 = arith.mulf %176, %175 : vector<8x4xf32>
    %cst_108 = arith.constant dense<0.000000e+00> : vector<8x4xf32>
    %178 = tpu.matmul %164, %153, %cst_108 {dimension_numbers = #tpu.dot_dimension_numbers<[1], [0], [0], [1], [0, 0, 1, 1], [], []>} : vector<8x8xf32>, vector<8x4xf32>, vector<8x4xf32> -> vector<8x4xf32>
    %179 = arith.addf %177, %178 : vector<8x4xf32>
    %c4_109 = arith.constant 4 : index
    %c0_110 = arith.constant 0 : index
    %c0_111 = arith.constant 0 : index
    %180 = vector.load %arg9[%c4_109, %c0_110, %c0_111] : memref<8x8x4xf32, #tpu.memory_space<vmem>>, vector<1x8x4xf32>
    %181 = vector.shape_cast %180 : vector<1x8x4xf32> to vector<8x4xf32>
    %182 = vector.shape_cast %179 : vector<8x4xf32> to vector<1x8x4xf32>
    tpu.vector_store %arg9[%c4_109, %c0_110, %c0_111], %182 {strides = array<i32>} : memref<8x8x4xf32, #tpu.memory_space<vmem>>, vector<1x8x4xf32>,
    %c4_112 = arith.constant 4 : index
    %c0_113 = arith.constant 0 : index
    %c0_114 = arith.constant 0 : index
    %183 = vector.load %arg7[%c4_112, %c0_113, %c0_114] : memref<8x8x1xf32, #tpu.memory_space<vmem>>, vector<1x8x1xf32>
    %184 = vector.shape_cast %183 : vector<1x8x1xf32> to vector<8x1xf32>
    %185 = vector.shape_cast %159 : vector<8x1xf32> to vector<1x8x1xf32>
    tpu.vector_store %arg7[%c4_112, %c0_113, %c0_114], %185 {strides = array<i32>} : memref<8x8x1xf32, #tpu.memory_space<vmem>>, vector<1x8x1xf32>,
    %186 = vector.extract_strided_slice %10 {offsets = [0, 20], sizes = [8, 4], strides = [1, 1]} : vector<8x32xf32> to vector<8x4xf32>
    %187 = vector.extract_strided_slice %6 {offsets = [0, 20], sizes = [8, 4], strides = [1, 1]} : vector<8x32xf32> to vector<8x4xf32>
    %188 = vector.extract_strided_slice %8 {offsets = [0, 20], sizes = [8, 4], strides = [1, 1]} : vector<8x32xf32> to vector<8x4xf32>
    %cst_115 = arith.constant dense<0.000000e+00> : vector<8x8xf32>
    %189 = tpu.matmul %186, %187, %cst_115 {dimension_numbers = #tpu.dot_dimension_numbers<[1], [1], [0], [0], [0, 0, 1, 0], [], []>} : vector<8x4xf32>, vector<8x4xf32>, vector<8x8xf32> -> vector<8x8xf32>
    %c5 = arith.constant 5 : index
    %c0_116 = arith.constant 0 : index
    %c0_117 = arith.constant 0 : index
    %190 = vector.load %arg7[%c5, %c0_116, %c0_117] : memref<8x8x1xf32, #tpu.memory_space<vmem>>, vector<1x8x1xf32>
    %191 = vector.shape_cast %190 : vector<1x8x1xf32> to vector<8x1xf32>
    %cst_118 = arith.constant dense<0xFF800000> : vector<8xf32>
    %192 = vector.multi_reduction <maximumf>, %189, %cst_118 [1] : vector<8x8xf32> to vector<8xf32>
    %193 = vector.shape_cast %192 : vector<8xf32> to vector<8x1xf32>
    %194 = arith.maximumf %191, %193 : vector<8x1xf32>
    %195 = arith.subf %191, %194 : vector<8x1xf32>
    %196 = math.exp %195 : vector<8x1xf32>
    %197 = vector.broadcast %194 : vector<8x1xf32> to vector<8x8xf32>
    %198 = arith.subf %189, %197 : vector<8x8xf32>
    %199 = math.exp %198 : vector<8x8xf32>
    %c5_119 = arith.constant 5 : index
    %c0_120 = arith.constant 0 : index
    %c0_121 = arith.constant 0 : index
    %200 = vector.load %arg8[%c5_119, %c0_120, %c0_121] : memref<8x8x1xf32, #tpu.memory_space<vmem>>, vector<1x8x1xf32>
    %201 = vector.shape_cast %200 : vector<1x8x1xf32> to vector<8x1xf32>
    %202 = arith.mulf %196, %201 : vector<8x1xf32>
    %cst_122 = arith.constant dense<0.000000e+00> : vector<8xf32>
    %203 = vector.multi_reduction <add>, %199, %cst_122 [1] : vector<8x8xf32> to vector<8xf32>
    %204 = vector.shape_cast %203 : vector<8xf32> to vector<8x1xf32>
    %205 = arith.addf %202, %204 : vector<8x1xf32>
    %c5_123 = arith.constant 5 : index
    %c0_124 = arith.constant 0 : index
    %c0_125 = arith.constant 0 : index
    %206 = vector.load %arg8[%c5_123, %c0_124, %c0_125] : memref<8x8x1xf32, #tpu.memory_space<vmem>>, vector<1x8x1xf32>
    %207 = vector.shape_cast %206 : vector<1x8x1xf32> to vector<8x1xf32>
    %208 = vector.shape_cast %205 : vector<8x1xf32> to vector<1x8x1xf32>
    tpu.vector_store %arg8[%c5_123, %c0_124, %c0_125], %208 {strides = array<i32>} : memref<8x8x1xf32, #tpu.memory_space<vmem>>, vector<1x8x1xf32>,
    %c5_126 = arith.constant 5 : index
    %c0_127 = arith.constant 0 : index
    %c0_128 = arith.constant 0 : index
    %209 = vector.load %arg9[%c5_126, %c0_127, %c0_128] : memref<8x8x4xf32, #tpu.memory_space<vmem>>, vector<1x8x4xf32>
    %210 = vector.shape_cast %209 : vector<1x8x4xf32> to vector<8x4xf32>
    %211 = vector.broadcast %196 : vector<8x1xf32> to vector<8x4xf32>
    %212 = arith.mulf %211, %210 : vector<8x4xf32>
    %cst_129 = arith.constant dense<0.000000e+00> : vector<8x4xf32>
    %213 = tpu.matmul %199, %188, %cst_129 {dimension_numbers = #tpu.dot_dimension_numbers<[1], [0], [0], [1], [0, 0, 1, 1], [], []>} : vector<8x8xf32>, vector<8x4xf32>, vector<8x4xf32> -> vector<8x4xf32>
    %214 = arith.addf %212, %213 : vector<8x4xf32>
    %c5_130 = arith.constant 5 : index
    %c0_131 = arith.constant 0 : index
    %c0_132 = arith.constant 0 : index
    %215 = vector.load %arg9[%c5_130, %c0_131, %c0_132] : memref<8x8x4xf32, #tpu.memory_space<vmem>>, vector<1x8x4xf32>
    %216 = vector.shape_cast %215 : vector<1x8x4xf32> to vector<8x4xf32>
    %217 = vector.shape_cast %214 : vector<8x4xf32> to vector<1x8x4xf32>
    tpu.vector_store %arg9[%c5_130, %c0_131, %c0_132], %217 {strides = array<i32>} : memref<8x8x4xf32, #tpu.memory_space<vmem>>, vector<1x8x4xf32>,
    %c5_133 = arith.constant 5 : index
    %c0_134 = arith.constant 0 : index
    %c0_135 = arith.constant 0 : index
    %218 = vector.load %arg7[%c5_133, %c0_134, %c0_135] : memref<8x8x1xf32, #tpu.memory_space<vmem>>, vector<1x8x1xf32>
    %219 = vector.shape_cast %218 : vector<1x8x1xf32> to vector<8x1xf32>
    %220 = vector.shape_cast %194 : vector<8x1xf32> to vector<1x8x1xf32>
    tpu.vector_store %arg7[%c5_133, %c0_134, %c0_135], %220 {strides = array<i32>} : memref<8x8x1xf32, #tpu.memory_space<vmem>>, vector<1x8x1xf32>,
    %221 = vector.extract_strided_slice %10 {offsets = [0, 24], sizes = [8, 4], strides = [1, 1]} : vector<8x32xf32> to vector<8x4xf32>
    %222 = vector.extract_strided_slice %6 {offsets = [0, 24], sizes = [8, 4], strides = [1, 1]} : vector<8x32xf32> to vector<8x4xf32>
    %223 = vector.extract_strided_slice %8 {offsets = [0, 24], sizes = [8, 4], strides = [1, 1]} : vector<8x32xf32> to vector<8x4xf32>
    %cst_136 = arith.constant dense<0.000000e+00> : vector<8x8xf32>
    %224 = tpu.matmul %221, %222, %cst_136 {dimension_numbers = #tpu.dot_dimension_numbers<[1], [1], [0], [0], [0, 0, 1, 0], [], []>} : vector<8x4xf32>, vector<8x4xf32>, vector<8x8xf32> -> vector<8x8xf32>
    %c6 = arith.constant 6 : index
    %c0_137 = arith.constant 0 : index
    %c0_138 = arith.constant 0 : index
    %225 = vector.load %arg7[%c6, %c0_137, %c0_138] : memref<8x8x1xf32, #tpu.memory_space<vmem>>, vector<1x8x1xf32>
    %226 = vector.shape_cast %225 : vector<1x8x1xf32> to vector<8x1xf32>
    %cst_139 = arith.constant dense<0xFF800000> : vector<8xf32>
    %227 = vector.multi_reduction <maximumf>, %224, %cst_139 [1] : vector<8x8xf32> to vector<8xf32>
    %228 = vector.shape_cast %227 : vector<8xf32> to vector<8x1xf32>
    %229 = arith.maximumf %226, %228 : vector<8x1xf32>
    %230 = arith.subf %226, %229 : vector<8x1xf32>
    %231 = math.exp %230 : vector<8x1xf32>
    %232 = vector.broadcast %229 : vector<8x1xf32> to vector<8x8xf32>
    %233 = arith.subf %224, %232 : vector<8x8xf32>
    %234 = math.exp %233 : vector<8x8xf32>
    %c6_140 = arith.constant 6 : index
    %c0_141 = arith.constant 0 : index
    %c0_142 = arith.constant 0 : index
    %235 = vector.load %arg8[%c6_140, %c0_141, %c0_142] : memref<8x8x1xf32, #tpu.memory_space<vmem>>, vector<1x8x1xf32>
    %236 = vector.shape_cast %235 : vector<1x8x1xf32> to vector<8x1xf32>
    %237 = arith.mulf %231, %236 : vector<8x1xf32>
    %cst_143 = arith.constant dense<0.000000e+00> : vector<8xf32>
    %238 = vector.multi_reduction <add>, %234, %cst_143 [1] : vector<8x8xf32> to vector<8xf32>
    %239 = vector.shape_cast %238 : vector<8xf32> to vector<8x1xf32>
    %240 = arith.addf %237, %239 : vector<8x1xf32>
    %c6_144 = arith.constant 6 : index
    %c0_145 = arith.constant 0 : index
    %c0_146 = arith.constant 0 : index
    %241 = vector.load %arg8[%c6_144, %c0_145, %c0_146] : memref<8x8x1xf32, #tpu.memory_space<vmem>>, vector<1x8x1xf32>
    %242 = vector.shape_cast %241 : vector<1x8x1xf32> to vector<8x1xf32>
    %243 = vector.shape_cast %240 : vector<8x1xf32> to vector<1x8x1xf32>
    tpu.vector_store %arg8[%c6_144, %c0_145, %c0_146], %243 {strides = array<i32>} : memref<8x8x1xf32, #tpu.memory_space<vmem>>, vector<1x8x1xf32>,
    %c6_147 = arith.constant 6 : index
    %c0_148 = arith.constant 0 : index
    %c0_149 = arith.constant 0 : index
    %244 = vector.load %arg9[%c6_147, %c0_148, %c0_149] : memref<8x8x4xf32, #tpu.memory_space<vmem>>, vector<1x8x4xf32>
    %245 = vector.shape_cast %244 : vector<1x8x4xf32> to vector<8x4xf32>
    %246 = vector.broadcast %231 : vector<8x1xf32> to vector<8x4xf32>
    %247 = arith.mulf %246, %245 : vector<8x4xf32>
    %cst_150 = arith.constant dense<0.000000e+00> : vector<8x4xf32>
    %248 = tpu.matmul %234, %223, %cst_150 {dimension_numbers = #tpu.dot_dimension_numbers<[1], [0], [0], [1], [0, 0, 1, 1], [], []>} : vector<8x8xf32>, vector<8x4xf32>, vector<8x4xf32> -> vector<8x4xf32>
    %249 = arith.addf %247, %248 : vector<8x4xf32>
    %c6_151 = arith.constant 6 : index
    %c0_152 = arith.constant 0 : index
    %c0_153 = arith.constant 0 : index
    %250 = vector.load %arg9[%c6_151, %c0_152, %c0_153] : memref<8x8x4xf32, #tpu.memory_space<vmem>>, vector<1x8x4xf32>
    %251 = vector.shape_cast %250 : vector<1x8x4xf32> to vector<8x4xf32>
    %252 = vector.shape_cast %249 : vector<8x4xf32> to vector<1x8x4xf32>
    tpu.vector_store %arg9[%c6_151, %c0_152, %c0_153], %252 {strides = array<i32>} : memref<8x8x4xf32, #tpu.memory_space<vmem>>, vector<1x8x4xf32>,
    %c6_154 = arith.constant 6 : index
    %c0_155 = arith.constant 0 : index
    %c0_156 = arith.constant 0 : index
    %253 = vector.load %arg7[%c6_154, %c0_155, %c0_156] : memref<8x8x1xf32, #tpu.memory_space<vmem>>, vector<1x8x1xf32>
    %254 = vector.shape_cast %253 : vector<1x8x1xf32> to vector<8x1xf32>
    %255 = vector.shape_cast %229 : vector<8x1xf32> to vector<1x8x1xf32>
    tpu.vector_store %arg7[%c6_154, %c0_155, %c0_156], %255 {strides = array<i32>} : memref<8x8x1xf32, #tpu.memory_space<vmem>>, vector<1x8x1xf32>,
    %256 = vector.extract_strided_slice %10 {offsets = [0, 28], sizes = [8, 4], strides = [1, 1]} : vector<8x32xf32> to vector<8x4xf32>
    %257 = vector.extract_strided_slice %6 {offsets = [0, 28], sizes = [8, 4], strides = [1, 1]} : vector<8x32xf32> to vector<8x4xf32>
    %258 = vector.extract_strided_slice %8 {offsets = [0, 28], sizes = [8, 4], strides = [1, 1]} : vector<8x32xf32> to vector<8x4xf32>
    %cst_157 = arith.constant dense<0.000000e+00> : vector<8x8xf32>
    %259 = tpu.matmul %256, %257, %cst_157 {dimension_numbers = #tpu.dot_dimension_numbers<[1], [1], [0], [0], [0, 0, 1, 0], [], []>} : vector<8x4xf32>, vector<8x4xf32>, vector<8x8xf32> -> vector<8x8xf32>
    %c7 = arith.constant 7 : index
    %c0_158 = arith.constant 0 : index
    %c0_159 = arith.constant 0 : index
    %260 = vector.load %arg7[%c7, %c0_158, %c0_159] : memref<8x8x1xf32, #tpu.memory_space<vmem>>, vector<1x8x1xf32>
    %261 = vector.shape_cast %260 : vector<1x8x1xf32> to vector<8x1xf32>
    %cst_160 = arith.constant dense<0xFF800000> : vector<8xf32>
    %262 = vector.multi_reduction <maximumf>, %259, %cst_160 [1] : vector<8x8xf32> to vector<8xf32>
    %263 = vector.shape_cast %262 : vector<8xf32> to vector<8x1xf32>
    %264 = arith.maximumf %261, %263 : vector<8x1xf32>
    %265 = arith.subf %261, %264 : vector<8x1xf32>
    %266 = math.exp %265 : vector<8x1xf32>
    %267 = vector.broadcast %264 : vector<8x1xf32> to vector<8x8xf32>
    %268 = arith.subf %259, %267 : vector<8x8xf32>
    %269 = math.exp %268 : vector<8x8xf32>
    %c7_161 = arith.constant 7 : index
    %c0_162 = arith.constant 0 : index
    %c0_163 = arith.constant 0 : index
    %270 = vector.load %arg8[%c7_161, %c0_162, %c0_163] : memref<8x8x1xf32, #tpu.memory_space<vmem>>, vector<1x8x1xf32>
    %271 = vector.shape_cast %270 : vector<1x8x1xf32> to vector<8x1xf32>
    %272 = arith.mulf %266, %271 : vector<8x1xf32>
    %cst_164 = arith.constant dense<0.000000e+00> : vector<8xf32>
    %273 = vector.multi_reduction <add>, %269, %cst_164 [1] : vector<8x8xf32> to vector<8xf32>
    %274 = vector.shape_cast %273 : vector<8xf32> to vector<8x1xf32>
    %275 = arith.addf %272, %274 : vector<8x1xf32>
    %c7_165 = arith.constant 7 : index
    %c0_166 = arith.constant 0 : index
    %c0_167 = arith.constant 0 : index
    %276 = vector.load %arg8[%c7_165, %c0_166, %c0_167] : memref<8x8x1xf32, #tpu.memory_space<vmem>>, vector<1x8x1xf32>
    %277 = vector.shape_cast %276 : vector<1x8x1xf32> to vector<8x1xf32>
    %278 = vector.shape_cast %275 : vector<8x1xf32> to vector<1x8x1xf32>
    tpu.vector_store %arg8[%c7_165, %c0_166, %c0_167], %278 {strides = array<i32>} : memref<8x8x1xf32, #tpu.memory_space<vmem>>, vector<1x8x1xf32>,
    %c7_168 = arith.constant 7 : index
    %c0_169 = arith.constant 0 : index
    %c0_170 = arith.constant 0 : index
    %279 = vector.load %arg9[%c7_168, %c0_169, %c0_170] : memref<8x8x4xf32, #tpu.memory_space<vmem>>, vector<1x8x4xf32>
    %280 = vector.shape_cast %279 : vector<1x8x4xf32> to vector<8x4xf32>
    %281 = vector.broadcast %266 : vector<8x1xf32> to vector<8x4xf32>
    %282 = arith.mulf %281, %280 : vector<8x4xf32>
    %cst_171 = arith.constant dense<0.000000e+00> : vector<8x4xf32>
    %283 = tpu.matmul %269, %258, %cst_171 {dimension_numbers = #tpu.dot_dimension_numbers<[1], [0], [0], [1], [0, 0, 1, 1], [], []>} : vector<8x8xf32>, vector<8x4xf32>, vector<8x4xf32> -> vector<8x4xf32>
    %284 = arith.addf %282, %283 : vector<8x4xf32>
    %c7_172 = arith.constant 7 : index
    %c0_173 = arith.constant 0 : index
    %c0_174 = arith.constant 0 : index
    %285 = vector.load %arg9[%c7_172, %c0_173, %c0_174] : memref<8x8x4xf32, #tpu.memory_space<vmem>>, vector<1x8x4xf32>
    %286 = vector.shape_cast %285 : vector<1x8x4xf32> to vector<8x4xf32>
    %287 = vector.shape_cast %284 : vector<8x4xf32> to vector<1x8x4xf32>
    tpu.vector_store %arg9[%c7_172, %c0_173, %c0_174], %287 {strides = array<i32>} : memref<8x8x4xf32, #tpu.memory_space<vmem>>, vector<1x8x4xf32>,
    %c7_175 = arith.constant 7 : index
    %c0_176 = arith.constant 0 : index
    %c0_177 = arith.constant 0 : index
    %288 = vector.load %arg7[%c7_175, %c0_176, %c0_177] : memref<8x8x1xf32, #tpu.memory_space<vmem>>, vector<1x8x1xf32>
    %289 = vector.shape_cast %288 : vector<1x8x1xf32> to vector<8x1xf32>
    %290 = vector.shape_cast %264 : vector<8x1xf32> to vector<1x8x1xf32>
    tpu.vector_store %arg7[%c7_175, %c0_176, %c0_177], %290 {strides = array<i32>} : memref<8x8x1xf32, #tpu.memory_space<vmem>>, vector<1x8x1xf32>,
    %c0_i32_178 = arith.constant 0 : i32
    %291 = arith.cmpi eq, %arg2, %c0_i32_178 : i32
    %292 = arith.extui %291 : i1 to i32
    %c0_i32_179 = arith.constant 0 : i32
    %293 = arith.cmpi ne, %292, %c0_i32_179 : i32
    scf.if %293 {
      %c0_180 = arith.constant 0 : index
      %c0_181 = arith.constant 0 : index
      %c0_182 = arith.constant 0 : index
      %294 = vector.load %arg9[%c0_180, %c0_181, %c0_182] : memref<8x8x4xf32, #tpu.memory_space<vmem>>, vector<1x8x4xf32>
      %295 = vector.shape_cast %294 : vector<1x8x4xf32> to vector<8x4xf32>
      %c0_183 = arith.constant 0 : index
      %c0_184 = arith.constant 0 : index
      %c0_185 = arith.constant 0 : index
      %296 = vector.load %arg8[%c0_183, %c0_184, %c0_185] : memref<8x8x1xf32, #tpu.memory_space<vmem>>, vector<1x8x1xf32>
      %297 = vector.shape_cast %296 : vector<1x8x1xf32> to vector<8x1xf32>
      %298 = tpu.reciprocal %297 {approx = true} : vector<8x1xf32> -> vector<8x1xf32>
      %299 = vector.broadcast %298 : vector<8x1xf32> to vector<8x4xf32>
      %300 = arith.mulf %295, %299 : vector<8x4xf32>
      %c1_186 = arith.constant 1 : index
      %c0_187 = arith.constant 0 : index
      %c0_188 = arith.constant 0 : index
      %301 = vector.load %arg9[%c1_186, %c0_187, %c0_188] : memref<8x8x4xf32, #tpu.memory_space<vmem>>, vector<1x8x4xf32>
      %302 = vector.shape_cast %301 : vector<1x8x4xf32> to vector<8x4xf32>
      %c1_189 = arith.constant 1 : index
      %c0_190 = arith.constant 0 : index
      %c0_191 = arith.constant 0 : index
      %303 = vector.load %arg8[%c1_189, %c0_190, %c0_191] : memref<8x8x1xf32, #tpu.memory_space<vmem>>, vector<1x8x1xf32>
      %304 = vector.shape_cast %303 : vector<1x8x1xf32> to vector<8x1xf32>
      %305 = tpu.reciprocal %304 {approx = true} : vector<8x1xf32> -> vector<8x1xf32>
      %306 = vector.broadcast %305 : vector<8x1xf32> to vector<8x4xf32>
      %307 = arith.mulf %302, %306 : vector<8x4xf32>
      %c2_192 = arith.constant 2 : index
      %c0_193 = arith.constant 0 : index
      %c0_194 = arith.constant 0 : index
      %308 = vector.load %arg9[%c2_192, %c0_193, %c0_194] : memref<8x8x4xf32, #tpu.memory_space<vmem>>, vector<1x8x4xf32>
      %309 = vector.shape_cast %308 : vector<1x8x4xf32> to vector<8x4xf32>
      %c2_195 = arith.constant 2 : index
      %c0_196 = arith.constant 0 : index
      %c0_197 = arith.constant 0 : index
      %310 = vector.load %arg8[%c2_195, %c0_196, %c0_197] : memref<8x8x1xf32, #tpu.memory_space<vmem>>, vector<1x8x1xf32>
      %311 = vector.shape_cast %310 : vector<1x8x1xf32> to vector<8x1xf32>
      %312 = tpu.reciprocal %311 {approx = true} : vector<8x1xf32> -> vector<8x1xf32>
      %313 = vector.broadcast %312 : vector<8x1xf32> to vector<8x4xf32>
      %314 = arith.mulf %309, %313 : vector<8x4xf32>
      %c3_198 = arith.constant 3 : index
      %c0_199 = arith.constant 0 : index
      %c0_200 = arith.constant 0 : index
      %315 = vector.load %arg9[%c3_198, %c0_199, %c0_200] : memref<8x8x4xf32, #tpu.memory_space<vmem>>, vector<1x8x4xf32>
      %316 = vector.shape_cast %315 : vector<1x8x4xf32> to vector<8x4xf32>
      %c3_201 = arith.constant 3 : index
      %c0_202 = arith.constant 0 : index
      %c0_203 = arith.constant 0 : index
      %317 = vector.load %arg8[%c3_201, %c0_202, %c0_203] : memref<8x8x1xf32, #tpu.memory_space<vmem>>, vector<1x8x1xf32>
      %318 = vector.shape_cast %317 : vector<1x8x1xf32> to vector<8x1xf32>
      %319 = tpu.reciprocal %318 {approx = true} : vector<8x1xf32> -> vector<8x1xf32>
      %320 = vector.broadcast %319 : vector<8x1xf32> to vector<8x4xf32>
      %321 = arith.mulf %316, %320 : vector<8x4xf32>
      %c4_204 = arith.constant 4 : index
      %c0_205 = arith.constant 0 : index
      %c0_206 = arith.constant 0 : index
      %322 = vector.load %arg9[%c4_204, %c0_205, %c0_206] : memref<8x8x4xf32, #tpu.memory_space<vmem>>, vector<1x8x4xf32>
      %323 = vector.shape_cast %322 : vector<1x8x4xf32> to vector<8x4xf32>
      %c4_207 = arith.constant 4 : index
      %c0_208 = arith.constant 0 : index
      %c0_209 = arith.constant 0 : index
      %324 = vector.load %arg8[%c4_207, %c0_208, %c0_209] : memref<8x8x1xf32, #tpu.memory_space<vmem>>, vector<1x8x1xf32>
      %325 = vector.shape_cast %324 : vector<1x8x1xf32> to vector<8x1xf32>
      %326 = tpu.reciprocal %325 {approx = true} : vector<8x1xf32> -> vector<8x1xf32>
      %327 = vector.broadcast %326 : vector<8x1xf32> to vector<8x4xf32>
      %328 = arith.mulf %323, %327 : vector<8x4xf32>
      %c5_210 = arith.constant 5 : index
      %c0_211 = arith.constant 0 : index
      %c0_212 = arith.constant 0 : index
      %329 = vector.load %arg9[%c5_210, %c0_211, %c0_212] : memref<8x8x4xf32, #tpu.memory_space<vmem>>, vector<1x8x4xf32>
      %330 = vector.shape_cast %329 : vector<1x8x4xf32> to vector<8x4xf32>
      %c5_213 = arith.constant 5 : index
      %c0_214 = arith.constant 0 : index
      %c0_215 = arith.constant 0 : index
      %331 = vector.load %arg8[%c5_213, %c0_214, %c0_215] : memref<8x8x1xf32, #tpu.memory_space<vmem>>, vector<1x8x1xf32>
      %332 = vector.shape_cast %331 : vector<1x8x1xf32> to vector<8x1xf32>
      %333 = tpu.reciprocal %332 {approx = true} : vector<8x1xf32> -> vector<8x1xf32>
      %334 = vector.broadcast %333 : vector<8x1xf32> to vector<8x4xf32>
      %335 = arith.mulf %330, %334 : vector<8x4xf32>
      %c6_216 = arith.constant 6 : index
      %c0_217 = arith.constant 0 : index
      %c0_218 = arith.constant 0 : index
      %336 = vector.load %arg9[%c6_216, %c0_217, %c0_218] : memref<8x8x4xf32, #tpu.memory_space<vmem>>, vector<1x8x4xf32>
      %337 = vector.shape_cast %336 : vector<1x8x4xf32> to vector<8x4xf32>
      %c6_219 = arith.constant 6 : index
      %c0_220 = arith.constant 0 : index
      %c0_221 = arith.constant 0 : index
      %338 = vector.load %arg8[%c6_219, %c0_220, %c0_221] : memref<8x8x1xf32, #tpu.memory_space<vmem>>, vector<1x8x1xf32>
      %339 = vector.shape_cast %338 : vector<1x8x1xf32> to vector<8x1xf32>
      %340 = tpu.reciprocal %339 {approx = true} : vector<8x1xf32> -> vector<8x1xf32>
      %341 = vector.broadcast %340 : vector<8x1xf32> to vector<8x4xf32>
      %342 = arith.mulf %337, %341 : vector<8x4xf32>
      %c7_222 = arith.constant 7 : index
      %c0_223 = arith.constant 0 : index
      %c0_224 = arith.constant 0 : index
      %343 = vector.load %arg9[%c7_222, %c0_223, %c0_224] : memref<8x8x4xf32, #tpu.memory_space<vmem>>, vector<1x8x4xf32>
      %344 = vector.shape_cast %343 : vector<1x8x4xf32> to vector<8x4xf32>
      %c7_225 = arith.constant 7 : index
      %c0_226 = arith.constant 0 : index
      %c0_227 = arith.constant 0 : index
      %345 = vector.load %arg8[%c7_225, %c0_226, %c0_227] : memref<8x8x1xf32, #tpu.memory_space<vmem>>, vector<1x8x1xf32>
      %346 = vector.shape_cast %345 : vector<1x8x1xf32> to vector<8x1xf32>
      %347 = tpu.reciprocal %346 {approx = true} : vector<8x1xf32> -> vector<8x1xf32>
      %348 = vector.broadcast %347 : vector<8x1xf32> to vector<8x4xf32>
      %349 = arith.mulf %344, %348 : vector<8x4xf32>
      %350 = tpu.concatenate %300, %307, %314, %321, %328, %335, %342, %349 in 1 : vector<8x4xf32>, vector<8x4xf32>, vector<8x4xf32>, vector<8x4xf32>, vector<8x4xf32>, vector<8x4xf32>, vector<8x4xf32>, vector<8x4xf32> -> vector<8x32xf32>
      %c0_228 = arith.constant 0 : index
      %c0_229 = arith.constant 0 : index
      %c0_230 = arith.constant 0 : index
      %351 = vector.load %arg6[%c0_228, %c0_229, %c0_230] : memref<1x8x32xf32, #tpu.memory_space<vmem>>, vector<1x8x32xf32>
      %352 = vector.shape_cast %351 : vector<1x8x32xf32> to vector<8x32xf32>
      %353 = vector.shape_cast %350 : vector<8x32xf32> to vector<1x8x32xf32>
      tpu.vector_store %arg6[%c0_228, %c0_229, %c0_230], %353 {strides = array<i32>} : memref<1x8x32xf32, #tpu.memory_space<vmem>>, vector<1x8x32xf32>,
    } else {
    }
    return
  }
  func.func @transform_0(%arg0: i32, %arg1: i32, %arg2: i32) -> (i32, i32, i32) {
    %c0_i32 = arith.constant 0 : i32
    %c0_i32_0 = arith.constant 0 : i32
    return %arg0, %arg1, %c0_i32 : i32, i32, i32
  }
  func.func @transform_1(%arg0: i32, %arg1: i32, %arg2: i32) -> (i32, i32, i32) {
    %c0_i32 = arith.constant 0 : i32
    %c0_i32_0 = arith.constant 0 : i32
    return %arg0, %arg2, %c0_i32 : i32, i32, i32
  }
  func.func @transform_2(%arg0: i32, %arg1: i32, %arg2: i32) -> (i32, i32, i32) {
    %c0_i32 = arith.constant 0 : i32
    %c0_i32_0 = arith.constant 0 : i32
    return %arg0, %arg2, %c0_i32 : i32, i32, i32
  }
  func.func @transform_3(%arg0: i32, %arg1: i32, %arg2: i32) -> (i32, i32, i32) {
    %c0_i32 = arith.constant 0 : i32
    %c0_i32_0 = arith.constant 0 : i32
    return %arg0, %arg1, %c0_i32 : i32, i32, i32
  }
}

</mosaic_0001>

<bundles_post_ra>
// kernel: scaled_dot_product_attention_block.1
= control target key start
LH: loop header
LB: loop body
LE: loop exit
PB: predicated region body
PF: predicated region fallthrough
CT: control target
= control target key end

     0   :  { %s3084_s0 = inlined_call_operand.hbm [shape: f32[2,8,32], index: 0, kind: input, shape index: {}]   ;;  %s3085_s1 = inlined_call_operand.hbm [shape: f32[2,8,32], index: 1, kind: input, shape index: {}]   ;;  %s3086_s2 = inlined_call_operand.hbm [shape: f32[2,8,32], index: 2, kind: input, shape index: {}]   ;;  %s3087_s3 = inlined_call_operand.hbm [shape: f32[2,8,32], index: 3, kind: output, shape index: {}]  }
   0x1   :  { %3091 = sst [smem:[#allocation17_spill]] %s3085_s1 }
   0x2   :  { %8 = vsyncpa [#allocation6], 0 }
   0x3   :  { %10 = vsyncpa [#allocation6 + $0x1], 0 }
   0x4   :  { %11 = vsyncpa [#allocation9], 0 }
   0x5   :  { %13 = vsyncpa [#allocation9 + $0x1], 0 }
   0x6   :  { %14 = vsyncpa [#allocation7], 0 }
   0x7   :  { %16 = vsyncpa [#allocation7 + $0x1], 0  ;;  %s2604_s12 = smov 0   ;;  %s2606_s13 = smov 0  }
   0x8   :  { %s2608_s14 = smov 0   ;;  %s2610_s15 = smov 0  }
   0x9   :  { %s2612_s16 = smov 0   ;;  %s2614_s17 = smov 0  }
   0xa LB: > { %3092 = sst [smem:[#allocation15_spill]] %s2556_s16  ;;  %s2635_s18 = sadd.s32 4294967295, %s2560_s17   ;;  %s2560_s17 = sphi %s2614_s17, %s22_s17   ;;  %s2556_s16 = sphi %s2612_s16, %s3104_s16   ;;  %s2552_s15 = sphi %s2610_s15, %s3103_s15   ;;  %s2548_s14 = sphi %s2608_s14, %s3107_s14   ;;  %s2544_s13 = sphi %s2606_s13, %s3106_s13   ;;  %s2540_s12 = sphi %s2604_s12, %s3105_s12  }
   0xb   : > { %s2098_s19 = sadd.s32 4294967294, %s2560_s17   ;;  %s41_s20 = sadd.s32 1, %s2556_s16 }
   0xc   : > { %s50_s21 = sadd.s32 1, %s2548_s14  ;;  %p43_p0 = scmp.ge.s32.totalorder %s41_s20, 2 }
   0xd   : > { %p57_p1 = scmp.ne.s32.totalorder %s2548_s14, %s2544_s13  ;;  %p58_p2 = scmp.eq.s32.totalorder %s2560_s17, 0 }
   0xe   : > { %p63_p3 = scmp.ne.s32.totalorder %s2544_s13, %s2540_s12  ;;  %s3109_s20 = smov (%p43_p0, %s41_s20), 0 }
   0xf   : > { %3093 = sst [smem:[#allocation16_spill]] %s3109_s20  ;;  %p2647_p4 = por %p58_p2, %p57_p1 }
  0x10   : > { %p64_p5 = scmp.eq.s32.totalorder %s2635_s18, 0  ;;  %s45_s23 = ssub.s32 %s2556_s16, %s3109_s20 }
  0x11   : > { %p145_p6 = scmp.eq.s32.totalorder %s2635_s18, 1  ;;  %p48_p7 = scmp.eq.s32.totalorder %s45_s23, 0 }
  0x12   : > { %p2655_p8 = por %p64_p5, %p63_p3  ;;  %p151_p10 = scmp.eq.s32.totalorder %s2098_s19, 1 }
  0x13   : > { %p2659_p9 = por %p145_p6, %p57_p1  ;;  %p2274_p13 = scmp.lt.s32.totalorder %s2560_s17, 2 }
  0x14   : > { %s2664_s26 = scalar_select %p48_p7, %s2548_s14, %s50_s21  }
  0x15   : > { %p2666_p11 = por %p151_p10, %p63_p3  ;;  %s3088_s28 = sand.u32 1, %s2548_s14  }
  0x16   : > { %s2675_s29 = sshll.u32 %s3088_s28, 3  ;;  %s2678_s30 = sshll.u32 %s2556_s16, 7 }
  0x17   : > { %p2682_p0 = pnand %p2274_p13, %p2647_p4  ;;  %s190_s5 = sand.u32 1, %s2560_s17  }
  0x18   : > { %s3099_s1 = sld [smem:[#allocation17_spill]]  ;;  %s194_s9 = scalar_lea.vmem [#allocation8], %s2675_s29 }
  0x19   : > { %s202_s10 = sshll.u32 %s194_s9, 4  ;;  %p2107_p1 = scmp.ge.s32.totalorder %s2560_s17, 1  ;;  %s203_s10 = int_to_ptr.vmem [resolvable:$true] %s202_s10 }
  0x1a   : > { %p226_p2 = scmp.lt.s32.totalorder %s2560_s17, 3  ;;  %s2694_s11 = scalar_lea.sflag [#allocation9], %s190_s5 }
  0x1b   : > { %p2394_p3 = pneg %p2682_p0  ;;  %s2405_s19 = scalar_lea.vmem %s203_s10, 128 }
  0x1c   : > { %p2406_p4 = scmp.ne.s32.totalorder %s203_s10, %s2405_s19  ;;  %s2562_s21 = smov [#allocation8]  }
  0x1d   : > { %s2410_s22 = sshll.u32 %s2562_s21, 4  ;;  %s2411_s22 = int_to_ptr.vmem [resolvable:$false] %s2410_s22 }
  0x1e   : > { %s200_s8 = scalar_lea.hbm %s3099_s1, %s2678_s30  ;;  %p2408_p5 = pnand %p2406_p4, %p2394_p3 }
  0x1f   : > { %s2412_s23 = scalar_lea.vmem %s2411_s22, 256  ;;  %p2413_p7 = scmp.lt.s32.totalorder %s203_s10, %s2411_s22 }
  0x20   : > { %p2409_p6 = pneg %p2408_p5  ;;  %p2414_p10 = scmp.lt.s32.totalorder %s2412_s23, %s2405_s19 }
  0x22   : > { %p2415_p13 = por %p2414_p10, %p2413_p7 }
  0x24   : > { %p2416_p12 = pnand %p2415_p13, %p2409_p6 }
  0x26   : > { %2419 = shalt.err (!%p2416_p12)
}
  0x27   : > { %2266 = dma.hbm_to_vmem [thread:$0]  (!%p2682_p0), %s200_s8, 128, %s203_s10, %s2694_s11  }
  0x28   : > { %p2708_p4 = pnand %p2107_p1, %p226_p2  ;;  %s181_s9 = scalar_lea.hbm %s3084_s0, %s2678_s30 }
  0x29   : > { %s175_s19 = scalar_lea.vmem [#allocation5], %s2675_s29  ;;  %s219_s28 = scalar_lea.hbm %s3086_s2, %s2678_s30 }
  0x2a   : > { %s183_s21 = sshll.u32 %s175_s19, 4  ;;  %s3101_s1 = sand.u32 1, %s2548_s14   ;;  %s184_s21 = int_to_ptr.vmem [resolvable:$true] %s183_s21 }
  0x2b   : > { %s172_s20 = scalar_lea.sflag [#allocation6], %s3101_s1  ;;  %s2433_s8 = scalar_lea.vmem %s184_s21, 128 }
  0x2c   : > { %p2434_p12 = scmp.ne.s32.totalorder %s184_s21, %s2433_s8  ;;  %s2563_s10 = smov [#allocation5]  }
  0x2d   : > { %s2438_s16 = sshll.u32 %s2563_s10, 4  ;;  %s2439_s16 = int_to_ptr.vmem [resolvable:$false] %s2438_s16 }
  0x2e   : > { %p2436_p1 = pnand %p2434_p12, %p2394_p3  ;;  %s2440_s6 = scalar_lea.vmem %s2439_s16, 256 }
  0x2f   : > { %p2441_p5 = scmp.lt.s32.totalorder %s184_s21, %s2439_s16  ;;  %p2442_p6 = scmp.lt.s32.totalorder %s2440_s6, %s2433_s8 }
  0x30   : > { %p2437_p2 = pneg %p2436_p1 }
  0x31   : > { %p2443_p7 = por %p2442_p6, %p2441_p5 }
  0x33   : > { %p2444_p10 = pnand %p2443_p7, %p2437_p2 }
  0x35   : > { %2447 = shalt.err (!%p2444_p10)
}
  0x36   : > { %2263 = dma.hbm_to_vmem [thread:$0]  (!%p2682_p0), %s181_s9, 128, %s184_s21, %s172_s20  }
  0x37   : > { %s213_s1 = scalar_lea.vmem [#allocation10], %s2675_s29  ;;  %s2564_s22 = smov [#allocation10]  }
  0x38   : > { %s221_s7 = sshll.u32 %s213_s1, 4  ;;  %s2466_s16 = sshll.u32 %s2564_s22, 4  ;;  %s222_s7 = int_to_ptr.vmem [resolvable:$true] %s221_s7  ;;  %s2467_s16 = int_to_ptr.vmem [resolvable:$false] %s2466_s16 }
  0x39   : > { %s2461_s19 = scalar_lea.vmem %s222_s7, 128  ;;  %s2468_s23 = scalar_lea.vmem %s2467_s16, 256 }
  0x3a   : > { %p2462_p13 = scmp.ne.s32.totalorder %s222_s7, %s2461_s19  ;;  %p2469_p2 = scmp.lt.s32.totalorder %s222_s7, %s2467_s16 }
  0x3b   : > { %p2470_p5 = scmp.lt.s32.totalorder %s2468_s23, %s2461_s19 }
  0x3c   : > { %p2464_p12 = pnand %p2462_p13, %p2394_p3 }
  0x3d   : > { %p2471_p6 = por %p2470_p5, %p2469_p2 }
  0x3e   : > { %p2465_p1 = pneg %p2464_p12 }
  0x40   : > { %p2472_p7 = pnand %p2471_p6, %p2465_p1 }
  0x42   : > { %2475 = shalt.err (!%p2472_p7)
}
  0x43   : > { %2269 = dma.hbm_to_vmem [thread:$0]  (!%p2682_p0), %s219_s28, 128, %s222_s7, %s2694_s11  }
  0x44   : > { %230 = sbr.rel (%p2708_p4) target bundleno = 1645 (0x66d), region = 32  ;;  %s2743_s9 = sand.u32 (!%p2708_p4), 1, %s2544_s13  }
  0x45   : > { %s2746_s21 = sshll.u32 (!%p2708_p4), %s2743_s9, 3  ;;  %s233_s4 = scalar_lea.sflag (!%p2708_p4), [#allocation6], %s2743_s9 }
  0x46   : > { %s236_s8 = scalar_lea.vmem (!%p2708_p4), [#allocation5], %s2746_s21 }
  0x49   : > { %2527 = dma.done.wait (%p2655_p8), %s233_s4, 128  }
  0x4a   : > { %2529 = vsyncadd (%p2655_p8), %s233_s4, 4294967168  ;;  %s241_s28 = sand.u32 1, %s2635_s18   ;;  %s245_s11 = scalar_lea.vmem [#allocation8], %s2746_s21 }
  0x4b   : > { %s242_s30 = scalar_lea.sflag [#allocation9], %s241_s28 }
  0x4c   : > { %2531 = dma.done.wait (%p2655_p8), %s242_s30, 256  }
  0x4d   : > { %2533 = vsyncadd (%p2655_p8), %s242_s30, 4294967040  ;;  %vm308_vm0 = vcmask 31744   ;;  %v2565_v0 = vmov 0.0   ;;  %vm2566_vm1 = vmmov 0   ;;  %v2782_v1 = vld [vmem:[%s245_s11] sm:$0xff]  ;;  %v317_v2 = vld [vmem:[%s236_s8] sm:$0xff] }
  0x4e   : > { %2172 = vmatprep.subr.mxu0 %v2565_v0  ;;  %309 = vst.msk [vmem:[#allocation4] sm:$0xff] %vm308_vm0, %v2565_v0  ;;  %310 = vst.msk [vmem:[#allocation4 + $0x8] sm:$0xff] %vm308_vm0, %v2565_v0  ;;  %2174 = vmatprep.mubr.msk.f32.mxu0 %vm2566_vm1, %v2565_v0  ;;  %v320_v3 = vmul.f32 0.5, %v317_v2  ;;  %vm291_vm2 = vcmask 7168   ;;  %s2567_s18 = smov 124   ;;  %v2568_v4 = vmov -inf  }
  0x4f   : > { %311 = vst.msk [vmem:[#allocation4 + $0x10] sm:$0xff] %vm308_vm0, %v2565_v0  ;;  %312 = vst.msk [vmem:[#allocation4 + $0x18] sm:$0xff] %vm308_vm0, %v2565_v0  ;;  %2177 = vmatprep.subr.mxu1 %v2565_v0  ;;  %2179 = vmatprep.mubr.msk.f32.mxu1 %vm2566_vm1, %v2565_v0  ;;  %s2569_s24 = smov 120   ;;  %s2570_s5 = smov 116   ;;  %vm399_vm3 = vcmask 64512   ;;  %v2573_v8 = vmov 0  }
  0x50   : > { %313 = vst.msk [vmem:[#allocation4 + $0x20] sm:$0xff] %vm308_vm0, %v2565_v0  ;;  %314 = vst.msk [vmem:[#allocation4 + $0x28] sm:$0xff] %vm308_vm0, %v2565_v0  ;;  %2173 = vmatpush3.xpose.msk.msra.mxu0 %vm308_vm0, %v2782_v1  ;;  %508 = vrot.lane.b32.xlu1 %v2782_v1, %s2567_s18  ;;  %s2571_s10 = smov 112   ;;  %s2572_s6 = smov 108   ;;  %vm1942_vm4 = vcmask 97280   ;;  %vm1944_vm5 = vcmask 130048  }
  0x51   : > { %315 = vst.msk [vmem:[#allocation4 + $0x30] sm:$0xff] %vm308_vm0, %v2565_v0  ;;  %316 = vst.msk [vmem:[#allocation4 + $0x38] sm:$0xff] %vm308_vm0, %v2565_v0  ;;  %2187 = vmatprep.subr.mxu0 %v2565_v0  ;;  %2342 = vset.pattern.permute.xlu0 %v2573_v8  ;;  %s2574_s1 = smov 104   ;;  %s254_s7 = scalar_lea.vmem [#allocation10], %s2746_s21  ;;  %vm1946_vm6 = vcmask 162816   ;;  %vm1948_vm7 = vcmask 195584  }
  0x52   : > { %292 = vst.msk [vmem:[#allocation2] sm:$0xff] %vm291_vm2, %v2568_v4  ;;  %293 = vst.msk [vmem:[#allocation2 + $0x8] sm:$0xff] %vm291_vm2, %v2568_v4  ;;  %2343 = vset.pattern.permute.xlu1 %v2573_v8  ;;  %v2831_v9 = vld [vmem:[%s254_s7] sm:$0xff]  ;;  %s2575_s19 = smov 100   ;;  %s2576_s22 = smov 4   ;;  %vm1950_vm8 = vcmask 228352  }
  0x53   : > { %2175 = vmatmul.mubr.msk.f32.vlgmr.msra.gmra.mxu0 %vm308_vm0, %v320_v3  ;;  %294 = vst.msk [vmem:[#allocation2 + $0x10] sm:$0xff] %vm291_vm2, %v2568_v4  ;;  %295 = vst.msk [vmem:[#allocation2 + $0x18] sm:$0xff] %vm291_vm2, %v2568_v4  ;;  %2178 = vmatpush3.msra.mxu1 %v2831_v9  ;;  %s2577_s16 = smov 8   ;;  %s2578_s23 = smov 12   ;;  %vm1952_vm9 = vcmask 261120  }
  0x54   : > { %2189 = vmatprep.mubr.msk.f32.mxu0 %vm2566_vm1, %v2565_v0  ;;  %296 = vst.msk [vmem:[#allocation2 + $0x20] sm:$0xff] %vm291_vm2, %v2568_v4  ;;  %297 = vst.msk [vmem:[#allocation2 + $0x28] sm:$0xff] %vm291_vm2, %v2568_v4  ;;  %506 = vrot.lane.b32.xlu1 %v320_v3, %s2567_s18  ;;  %s2579_s20 = smov 20   ;;  %s2580_s29 = smov 16  }
  0x55   : > { %298 = vst.msk [vmem:[#allocation2 + $0x30] sm:$0xff] %vm291_vm2, %v2568_v4  ;;  %299 = vst.msk [vmem:[#allocation2 + $0x38] sm:$0xff] %vm291_vm2, %v2568_v4  ;;  %2182 = vmatprep.subr.mxu1 %v2565_v0  ;;  %v423_v41 = vld [vmem:[#allocation4] sm:$0xff]  ;;  %s2581_s4 = smov 24   ;;  %s2582_s8 = smov 28  }
  0x56   : > { %300 = vst.msk [vmem:[#allocation3] sm:$0xff] %vm291_vm2, %v2565_v0  ;;  %301 = vst.msk [vmem:[#allocation3 + $0x8] sm:$0xff] %vm291_vm2, %v2565_v0  ;;  %s2137_s28 = sshll.u32 %s2552_s15, 7  ;;  %s286_s30 = scalar_lea.vmem [#allocation11], %s2746_s21 }
  0x57   : > { %302 = vst.msk [vmem:[#allocation3 + $0x10] sm:$0xff] %vm291_vm2, %v2565_v0  ;;  %303 = vst.msk [vmem:[#allocation3 + $0x18] sm:$0xff] %vm291_vm2, %v2565_v0  ;;  %s1969_s11 = sshll.u32 %s286_s30, 4  ;;  %s2583_s15 = smov [#allocation11]   ;;  %s1970_s11 = int_to_ptr.vmem [resolvable:$true] %s1969_s11 }
  0x58   : > { %304 = vst.msk [vmem:[#allocation3 + $0x20] sm:$0xff] %vm291_vm2, %v2565_v0  ;;  %305 = vst.msk [vmem:[#allocation3 + $0x28] sm:$0xff] %vm291_vm2, %v2565_v0  ;;  %699 = vrot.lane.b32.xlu1 %v2782_v1, %s2569_s24  ;;  %s2480_s21 = sshll.u32 %s2583_s15, 4  ;;  %s2481_s21 = int_to_ptr.vmem [resolvable:$false] %s2480_s21 }
  0x59   : > { %306 = vst.msk [vmem:[#allocation3 + $0x30] sm:$0xff] %vm291_vm2, %v2565_v0  ;;  %307 = vst.msk [vmem:[#allocation3 + $0x38] sm:$0xff] %vm291_vm2, %v2565_v0  ;;  %v398_v10 = vld [vmem:[#allocation2] sm:$0xff]  ;;  %p2483_p4 = scmp.lt.s32.totalorder %s1970_s11, %s2481_s21 }
  0x5a   : > { %v776_v4 = vld [vmem:[#allocation2 + $0x10] sm:$0xff]  ;;  %v966_v8 = vld [vmem:[#allocation2 + $0x18] sm:$0xff] }
  0x5c   : > { %697 = vrot.lane.b32.xlu1 %v320_v3, %s2569_s24 }
  0x5d   : > { %v415_v36 = vld [vmem:[#allocation3] sm:$0xff] }
  0x60   : > { %889 = vrot.lane.b32.xlu1 %v2782_v1, %s2570_s5 }
  0x64   : > { %887 = vrot.lane.b32.xlu1 %v320_v3, %s2570_s5 }
  0x68   : > { %1079 = vrot.lane.b32.xlu1 %v2782_v1, %s2571_s10 }
  0x6c   : > { %1077 = vrot.lane.b32.xlu1 %v320_v3, %s2571_s10 }
  0x70   : > { %1269 = vrot.lane.b32.xlu1 %v2782_v1, %s2572_s6 }
  0x74   : > { %1267 = vrot.lane.b32.xlu1 %v320_v3, %s2572_s6 }
  0x78   : > { %1459 = vrot.lane.b32.xlu1 %v2782_v1, %s2574_s1 }
  0x7c   : > { %1457 = vrot.lane.b32.xlu1 %v320_v3, %s2574_s1 }
  0x80   : > { %1647 = vrot.lane.b32.xlu1 %v320_v3, %s2575_s19 }
  0x84   : > { %808 = vrot.lane.b32.xlu1 %v2831_v9, %s2569_s24 }
  0xc2   : > { %v509_v16 = vpop.permute.xlu1 %508 }
  0xc6   : > { %v507_v17 = vpop.permute.xlu1 %506 }
  0xca   : > { %v700_v18 = vpop.permute.xlu1 %699 }
  0xce   : > { %v698_v19 = vpop.permute.xlu1 %697 }
  0xd2   : > { %v890_v20 = vpop.permute.xlu1 %889 }
  0xd6   : > { %v888_v24 = vpop.permute.xlu1 %887 }
  0xda   : > { %v1080_v27 = vpop.permute.xlu1 %1079 }
  0xde   : > { %v1078_v28 = vpop.permute.xlu1 %1077 }
  0xe2   : > { %v1270_v31 = vpop.permute.xlu1 %1269 }
  0xe6   : > { %v1268_v32 = vpop.permute.xlu1 %1267 }
  0xea   : > { %v1460_v33 = vpop.permute.xlu1 %1459 }
  0xee   : > { %v1458_v34 = vpop.permute.xlu1 %1457 }
  0xf2   : > { %v1648_v35 = vpop.permute.xlu1 %1647 }
  0xf6   : > { %v2881_v40 = vpop.permute.xlu1 %808 }
 0x113   : > { %v394_v5 = vpop.f32.mrf.mxu0 }
 0x114   : > { %v400_v6 = vsel %vm399_vm3, %v394_v5, -inf }
 0x115   : > { %401 = vmax.xlane.f32.xlu0 %v400_v6  ;;  %v2176_v7 = vpop.f32.mrf.mxu0 }
 0x19e   : > { %v402_v11 = vpop.xlane.xlu0 %401 }
 0x19f   : > { %v403_v12 = vmax.f32 %v398_v10, %v402_v11 }
 0x1a1   : > { %v404_v13 = vsub.f32 %v398_v10, %v403_v12  ;;  %505 = vst.msk [vmem:[#allocation2] sm:$0xff] %vm291_vm2, %v403_v12  ;;  %409 = vperm.xlu0 %2342, %v403_v12  }
 0x1a3   : > { %v405_v14 = vmul.f32 1.442695, %v404_v13 }
 0x1a5   : > { %2344 = vpow2.f32 %v405_v14  ;;  %1649 = vrot.lane.b32.xlu0 %v2782_v1, %s2575_s19  ;;  %v585_v1 = vld [vmem:[#allocation2 + $0x8] sm:$0xff] }
 0x1a9   : > { %618 = vrot.lane.b32.xlu0 %v2831_v9, %s2567_s18 }
 0x1b2   : > { %v2345_v15 = vpop.eup %2344 }
 0x1b3   : > { %426 = vperm.xlu1 %2343, %v2345_v15   ;;  %v416_v37 = vmul.f32 %v2345_v15, %v415_v36 }
 0x21c   : > { %v410_v21 = vpop.permute.xlu0 %409 }
 0x21d   : > { %v412_v22 = vsub.f32 %v394_v5, %v410_v21 }
 0x21f   : > { %v413_v23 = vmul.f32 1.442695, %v412_v22 }
 0x220   : > { %v1650_v25 = vpop.permute.xlu0 %1649 }
 0x221   : > { %2346 = vpow2.f32 %v413_v23 }
 0x224   : > { %v619_v26 = vpop.permute.xlu0 %618 }
 0x225   : > { %2188 = vmatpush3.msra.mxu0 %v619_v26 }
 0x226   : > { %2197 = vmatprep.subr.mxu0 %v2565_v0 }
 0x22e   : > { %v2347_v29 = vpop.eup %2346  ;;  %v427_v42 = vpop.permute.xlu1 %426 }
 0x22f   : > { %2180 = vmatmul.mubr.msk.f32.vlgmr.msra.gmra.mxu1 %vm399_vm3, %v2347_v29  ;;  %v417_v30 = vsel %vm399_vm3, %v2347_v29, 0.0  ;;  %v429_v43 = vmul.f32 %v427_v42, %v423_v41 }
 0x230   : > { %2183 = vmatpush3.xpose.msk.msra.mxu1 %vm308_vm0, %v509_v16  ;;  %418 = vadd.xlane.f32.xlu0 %v417_v30 }
 0x231   : > { %2184 = vmatprep.mubr.msk.f32.mxu1 %vm2566_vm1, %v2565_v0  ;;  %2192 = vmatprep.subr.mxu1 %v2565_v0 }
 0x233   : > { %2185 = vmatmul.mubr.msk.f32.vlgmr.msra.gmra.mxu1 %vm308_vm0, %v507_v17 }
 0x234   : > { %2193 = vmatpush3.xpose.msk.msra.mxu1 %vm308_vm0, %v700_v18  ;;  %2194 = vmatprep.mubr.msk.f32.mxu1 %vm2566_vm1, %v2565_v0 }
 0x235   : > { %2202 = vmatprep.subr.mxu1 %v2565_v0 }
 0x237   : > { %2195 = vmatmul.mubr.msk.f32.vlgmr.msra.gmra.mxu1 %vm308_vm0, %v698_v19 }
 0x238   : > { %2203 = vmatpush3.xpose.msk.msra.mxu1 %vm308_vm0, %v890_v20  ;;  %2204 = vmatprep.mubr.msk.f32.mxu1 %vm2566_vm1, %v2565_v0 }
 0x239   : > { %2212 = vmatprep.subr.mxu1 %v2565_v0 }
 0x23b   : > { %2205 = vmatmul.mubr.msk.f32.vlgmr.msra.gmra.mxu1 %vm308_vm0, %v888_v24 }
 0x23c   : > { %2213 = vmatpush3.xpose.msk.msra.mxu1 %vm308_vm0, %v1080_v27  ;;  %2214 = vmatprep.mubr.msk.f32.mxu1 %vm2566_vm1, %v2565_v0  ;;  %v1346_v27 = vld [vmem:[#allocation2 + $0x28] sm:$0xff] }
 0x23d   : > { %2222 = vmatprep.subr.mxu1 %v2565_v0 }
 0x23f   : > { %2215 = vmatmul.mubr.msk.f32.vlgmr.msra.gmra.mxu1 %vm308_vm0, %v1078_v28 }
 0x240   : > { %2223 = vmatpush3.xpose.msk.msra.mxu1 %vm308_vm0, %v1270_v31  ;;  %2224 = vmatprep.mubr.msk.f32.mxu1 %vm2566_vm1, %v2565_v0 }
 0x241   : > { %2232 = vmatprep.subr.mxu1 %v2565_v0 }
 0x243   : > { %2225 = vmatmul.mubr.msk.f32.vlgmr.msra.gmra.mxu1 %vm308_vm0, %v1268_v32  ;;  %v2917_v32 = vld [vmem:[#allocation2 + $0x30] sm:$0xff] }
 0x244   : > { %2233 = vmatpush3.xpose.msk.msra.mxu1 %vm308_vm0, %v1460_v33  ;;  %2234 = vmatprep.mubr.msk.f32.mxu1 %vm2566_vm1, %v2565_v0 }
 0x245   : > { %2242 = vmatprep.subr.mxu1 %v2565_v0 }
 0x247   : > { %2235 = vmatmul.mubr.msk.f32.vlgmr.msra.gmra.mxu1 %vm308_vm0, %v1458_v34 }
 0x248   : > { %2243 = vmatpush3.xpose.msk.msra.mxu1 %vm308_vm0, %v1650_v25  ;;  %2244 = vmatprep.mubr.msk.f32.mxu1 %vm2566_vm1, %v2565_v0 }
 0x24b   : > { %2245 = vmatmul.mubr.msk.f32.vlgmr.msra.gmra.mxu1 %vm308_vm0, %v1648_v35 }
 0x2b9   : > { %v419_v38 = vpop.xlane.xlu0 %418 }
 0x2ba   : > { %v420_v39 = vadd.f32 %v419_v38, %v416_v37  ;;  %v2925_v38 = vld [vmem:[#allocation2 + $0x38] sm:$0xff] }
 0x2bc   : > { %422 = vst.msk [vmem:[#allocation3] sm:$0xff] %vm291_vm2, %v420_v39 }
 0x2ef   : > { %v499_v44 = vpop.f32.mrf.mxu1 }
 0x2f0   : > { %v503_v45 = vadd.f32 %v499_v44, %v429_v43 }
 0x2f1   : > { %v2181_v46 = vpop.f32.mrf.mxu1 }
 0x2f2   : > { %504 = vst.msk [vmem:[#allocation4] sm:$0xff] %vm308_vm0, %v503_v45 }
 0x2f3   : > { %v580_v47 = vpop.f32.mrf.mxu1 }
 0x2f4   : > { %v586_v48 = vsel %vm399_vm3, %v580_v47, -inf }
 0x2f5   : > { %v2186_v49 = vpop.f32.mrf.mxu1  ;;  %587 = vmax.xlane.f32.xlu1 %v586_v48 }
 0x2f7   : > { %v771_v50 = vpop.f32.mrf.mxu1 }
 0x2f8   : > { %v777_v51 = vsel %vm399_vm3, %v771_v50, -inf }
 0x2f9   : > { %v2196_v52 = vpop.f32.mrf.mxu1  ;;  %778 = vmax.xlane.f32.xlu0 %v777_v51 }
 0x2fb   : > { %v2886_v53 = vpop.f32.mrf.mxu1 }
 0x2fc   : > { %v967_v54 = vsel %vm399_vm3, %v2886_v53, -inf }
 0x2fd   : > { %968 = vmax.xlane.f32.xlu0 %v967_v54  ;;  %v2206_v55 = vpop.f32.mrf.mxu1 }
 0x2ff   : > { %v2890_v56 = vpop.f32.mrf.mxu1 }
 0x300   : > { %v1157_v17 = vsel %vm399_vm3, %v2890_v56, -inf }
 0x301   : > { %v2216_v57 = vpop.f32.mrf.mxu1 }
 0x303   : > { %v2892_v58 = vpop.f32.mrf.mxu1 }
 0x304   : > { %v1347_v14 = vsel %vm399_vm3, %v2892_v58, -inf }
 0x305   : > { %v2226_v59 = vpop.f32.mrf.mxu1 }
 0x307   : > { %v2894_v60 = vpop.f32.mrf.mxu1 }
 0x308   : > { %v1537_v15 = vsel %vm399_vm3, %v2894_v60, -inf }
 0x309   : > { %v2236_v61 = vpop.f32.mrf.mxu1 }
 0x30b   : > { %v2896_v62 = vpop.f32.mrf.mxu1 }
 0x30c   : > { %v1727_v16 = vsel %vm399_vm3, %v2896_v62, -inf }
 0x30d   : > { %v2246_v63 = vpop.f32.mrf.mxu1 }
 0x37e   : > { %v588_v2 = vpop.xlane.xlu1 %587 }
 0x37f   : > { %v589_v3 = vmax.f32 %v585_v1, %v588_v2 }
 0x381   : > { %v590_v5 = vsub.f32 %v585_v1, %v589_v3  ;;  %696 = vst.msk [vmem:[#allocation2 + $0x8] sm:$0xff] %vm291_vm2, %v589_v3  ;;  %595 = vperm.xlu0 %2342, %v589_v3  }
 0x382   : > { %v779_v6 = vpop.xlane.xlu0 %778 }
 0x383   : > { %v780_v7 = vmax.f32 %v776_v4, %v779_v6  ;;  %v591_v26 = vmul.f32 1.442695, %v590_v5 }
 0x385   : > { %v781_v10 = vsub.f32 %v776_v4, %v780_v7  ;;  %886 = vst.msk [vmem:[#allocation2 + $0x10] sm:$0xff] %vm291_vm2, %v780_v7  ;;  %786 = vperm.xlu1 %2343, %v780_v7  }
 0x386   : > { %v969_v11 = vpop.xlane.xlu0 %968 }
 0x387   : > { %v970_v12 = vmax.f32 %v966_v8, %v969_v11  ;;  %v782_v31 = vmul.f32 1.442695, %v781_v10 }
 0x389   : > { %v971_v13 = vsub.f32 %v966_v8, %v970_v12  ;;  %1076 = vst.msk [vmem:[#allocation2 + $0x18] sm:$0xff] %vm291_vm2, %v970_v12 }
 0x38b   : > { %v972_v29 = vmul.f32 1.442695, %v971_v13 }
 0x3a0   : > { %1348 = vmax.xlane.f32.xlu0 %v1347_v14 }
 0x3a4   : > { %1538 = vmax.xlane.f32.xlu0 %v1537_v15 }
 0x3a8   : > { %1728 = vmax.xlane.f32.xlu0 %v1727_v16 }
 0x3a9   : > { %1158 = vmax.xlane.f32.xlu1 %v1157_v17 }
 0x3be   : > { %976 = vperm.xlu0 %2342, %v970_v12  }
 0x3fc   : > { %v596_v18 = vpop.permute.xlu0 %595 }
 0x3fd   : > { %v598_v19 = vsub.f32 %v580_v47, %v596_v18 }
 0x3ff   : > { %v599_v20 = vmul.f32 1.442695, %v598_v19 }
 0x400   : > { %v787_v21 = vpop.permute.xlu1 %786 }
 0x401   : > { %2348 = vpow2.f32 %v599_v20  ;;  %v789_v22 = vsub.f32 %v771_v50, %v787_v21  ;;  %v610_v21 = vld [vmem:[#allocation4 + $0x8] sm:$0xff] }
 0x403   : > { %v790_v23 = vmul.f32 1.442695, %v789_v22 }
 0x405   : > { %2350 = vpow2.f32 %v790_v23 }
 0x406   : > { %2352 = vpow2.f32 %v591_v26 }
 0x407   : > { %2354 = vpow2.f32 %v972_v29 }
 0x408   : > { %2356 = vpow2.f32 %v782_v31 }
 0x40e   : > { %v2349_v24 = vpop.eup %2348 }
 0x40f   : > { %2190 = vmatmul.mubr.msk.f32.vlgmr.msra.gmra.mxu0 %vm399_vm3, %v2349_v24  ;;  %v604_v54 = vsel %vm399_vm3, %v2349_v24, 0.0  ;;  %v801_v24 = vld [vmem:[#allocation4 + $0x10] sm:$0xff] }
 0x410   : > { %2198 = vmatpush3.msra.mxu0 %v2881_v40  ;;  %2199 = vmatprep.mubr.msk.f32.mxu0 %vm2566_vm1, %v2565_v0  ;;  %v2932_v40 = vld [vmem:[#allocation2 + $0x20] sm:$0xff] }
 0x411   : > { %2207 = vmatprep.subr.mxu0 %v2565_v0 }
 0x412   : > { %v2351_v25 = vpop.eup %2350 }
 0x413   : > { %2200 = vmatmul.mubr.msk.f32.vlgmr.msra.gmra.mxu0 %vm399_vm3, %v2351_v25  ;;  %v2923_v37 = vpop.eup %2352  ;;  %v795_v55 = vsel %vm399_vm3, %v2351_v25, 0.0 }
 0x414   : > { %2209 = vmatprep.mubr.msk.f32.mxu0 %vm2566_vm1, %v2565_v0  ;;  %v2953_v47 = vpop.eup %2354 }
 0x415   : > { %v2955_v48 = vpop.eup %2356 }
 0x429   : > { %v1349_v28 = vpop.xlane.xlu0 %1348 }
 0x42a   : > { %v1350_v30 = vmax.f32 %v1346_v27, %v1349_v28 }
 0x42c   : > { %v1351_v33 = vsub.f32 %v1346_v27, %v1350_v30  ;;  %1456 = vst.msk [vmem:[#allocation2 + $0x28] sm:$0xff] %vm291_vm2, %v1350_v30  ;;  %1356 = vperm.xlu1 %2343, %v1350_v30  }
 0x42d   : > { %v1539_v34 = vpop.xlane.xlu0 %1538 }
 0x42e   : > { %v1352_v35 = vmul.f32 1.442695, %v1351_v33  ;;  %v2921_v36 = vmax.f32 %v2917_v32, %v1539_v34  ;;  %v1841_v34 = vld [vmem:[#allocation3] sm:$0xff] }
 0x430   : > { %2358 = vpow2.f32 %v1352_v35  ;;  %v1541_v39 = vsub.f32 %v2917_v32, %v2921_v36  ;;  %1646 = vst.msk [vmem:[#allocation2 + $0x30] sm:$0xff] %vm291_vm2, %v2921_v36  ;;  %613 = vperm.xlu1 %2343, %v2923_v37  }
 0x431   : > { %v1729_v41 = vpop.xlane.xlu0 %1728 }
 0x432   : > { %v2935_v42 = vmax.f32 %v2925_v38, %v1729_v41  ;;  %v1159_v43 = vpop.xlane.xlu1 %1158  ;;  %v1542_v26 = vmul.f32 1.442695, %v1541_v39 }
 0x433   : > { %v2938_v44 = vmax.f32 %v2932_v40, %v1159_v43 }
 0x434   : > { %v1731_v45 = vsub.f32 %v2925_v38, %v2935_v42  ;;  %1836 = vst.msk [vmem:[#allocation2 + $0x38] sm:$0xff] %vm291_vm2, %v2935_v42  ;;  %1736 = vperm.xlu1 %2343, %v2935_v42   ;;  %v602_v38 = vld [vmem:[#allocation3 + $0x8] sm:$0xff] }
 0x435   : > { %v1161_v46 = vsub.f32 %v2932_v40, %v2938_v44  ;;  %1266 = vst.msk [vmem:[#allocation2 + $0x20] sm:$0xff] %vm291_vm2, %v2938_v44  ;;  %1166 = vperm.xlu0 %2342, %v2938_v44   ;;  %v603_v42 = vmul.f32 %v2923_v37, %v602_v38  ;;  %v793_v44 = vld [vmem:[#allocation3 + $0x10] sm:$0xff] }
 0x437   : > { %v1162_v22 = vmul.f32 1.442695, %v1161_v46  ;;  %v794_v46 = vmul.f32 %v2955_v48, %v793_v44 }
 0x438   : > { %1188 = vrot.lane.b32.xlu1 %v2831_v9, %s2571_s10  ;;  %s1955_s10 = scalar_lea.sflag [#allocation7], %s2743_s9 }
 0x439   : > { %1546 = vperm.xlu0 %2342, %v2921_v36   ;;  %v977_v50 = vpop.permute.xlu0 %976 }
 0x43a   : > { %v979_v51 = vsub.f32 %v2886_v53, %v977_v50 }
 0x43c   : > { %994 = vperm.xlu1 %2343, %v2953_v47   ;;  %v980_v52 = vmul.f32 1.442695, %v979_v51  ;;  %v983_v51 = vld [vmem:[#allocation3 + $0x18] sm:$0xff] }
 0x43d   : > { %v2958_v49 = vpop.eup %2358  ;;  %804 = vperm.xlu0 %2342, %v2955_v48  }
 0x43e   : > { %2360 = vpow2.f32 %v980_v52 }
 0x440   : > { %1374 = vperm.xlu1 %2343, %v2958_v49  }
 0x441   : > { %998 = vrot.lane.b32.xlu0 %v2831_v9, %s2570_s5  ;;  %s3042_s5 = scalar_lea.hbm %s3087_s3, %s2137_s28 }
 0x445   : > { %1378 = vrot.lane.b32.xlu0 %v2831_v9, %s2572_s6  ;;  %s2476_s6 = scalar_lea.vmem %s1970_s11, 128 }
 0x446   : > { %p2477_p8 = scmp.ne.s32.totalorder %s1970_s11, %s2476_s6 }
 0x448   : > { %p2478_p0 = pnand %p2477_p8, %p2659_p9 }
 0x449   : > { %1568 = vrot.lane.b32.xlu0 %v2831_v9, %s2574_s1  ;;  %s2482_s1 = scalar_lea.vmem %s2481_s21, 256 }
 0x44a   : > { %p2479_p3 = pneg %p2478_p0  ;;  %p2484_p10 = scmp.lt.s32.totalorder %s2482_s1, %s2476_s6 }
 0x44b   : > { %v2361_v57 = vpop.eup %2360 }
 0x44c   : > { %v985_v59 = vsel %vm399_vm3, %v2361_v57, 0.0  ;;  %p2485_p13 = por %p2484_p10, %p2483_p4 }
 0x44d   : > { %1758 = vrot.lane.b32.xlu0 %v2831_v9, %s2575_s19 }
 0x44e   : > { %p2486_p12 = pnand %p2485_p13, %p2479_p3 }
 0x464   : > { %605 = vadd.xlane.f32.xlu1 %v604_v54  ;;  %v984_v54 = vmul.f32 %v2953_v47, %v983_v51 }
 0x468   : > { %796 = vadd.xlane.f32.xlu1 %v795_v55 }
 0x46c   : > { %986 = vadd.xlane.f32.xlu1 %v985_v59 }
 0x4a7   : > { %v1357_v61 = vpop.permute.xlu1 %1356 }
 0x4a8   : > { %v1359_v63 = vsub.f32 %v2892_v58, %v1357_v61 }
 0x4aa   : > { %v1360_v1 = vmul.f32 1.442695, %v1359_v63 }
 0x4ab   : > { %v614_v9 = vpop.permute.xlu1 %613 }
 0x4ac   : > { %2362 = vpow2.f32 %v1360_v1  ;;  %v616_v23 = vmul.f32 %v614_v9, %v610_v21  ;;  %v1363_v9 = vld [vmem:[#allocation3 + $0x28] sm:$0xff] }
 0x4af   : > { %v1737_v2 = vpop.permute.xlu1 %1736 }
 0x4b0   : > { %v1739_v53 = vsub.f32 %v2896_v62, %v1737_v2  ;;  %v1167_v3 = vpop.permute.xlu0 %1166  ;;  %v1364_v2 = vmul.f32 %v2958_v49, %v1363_v9 }
 0x4b1   : > { %v1169_v4 = vsub.f32 %v2890_v56, %v1167_v3  ;;  %v1173_v3 = vld [vmem:[#allocation3 + $0x20] sm:$0xff] }
 0x4b2   : > { %v1740_v5 = vmul.f32 1.442695, %v1739_v53 }
 0x4b3   : > { %v1170_v6 = vmul.f32 1.442695, %v1169_v4  ;;  %v1189_v62 = vpop.permute.xlu1 %1188 }
 0x4b4   : > { %v1547_v7 = vpop.permute.xlu0 %1546 }
 0x4b5   : > { %2364 = vpow2.f32 %v1170_v6  ;;  %v1549_v8 = vsub.f32 %v2894_v60, %v1547_v7  ;;  %v1553_v6 = vld [vmem:[#allocation3 + $0x30] sm:$0xff]  ;;  %v1743_v7 = vld [vmem:[#allocation3 + $0x38] sm:$0xff] }
 0x4b6   : > { %2366 = vpow2.f32 %v1740_v5 }
 0x4b7   : > { %v1550_v10 = vmul.f32 1.442695, %v1549_v8  ;;  %v3010_v36 = vpop.permute.xlu1 %994 }
 0x4b8   : > { %v805_v11 = vpop.permute.xlu0 %804 }
 0x4b9   : > { %v2363_v12 = vpop.eup %2362  ;;  %2368 = vpow2.f32 %v1550_v10  ;;  %v807_v29 = vmul.f32 %v805_v11, %v801_v24 }
 0x4ba   : > { %v1365_v58 = vsel %vm399_vm3, %v2363_v12, 0.0  ;;  %2370 = vpow2.f32 %v1162_v22  ;;  %v991_v22 = vld [vmem:[#allocation4 + $0x18] sm:$0xff] }
 0x4bb   : > { %1366 = vadd.xlane.f32.xlu0 %v1365_v58  ;;  %2372 = vpow2.f32 %v1542_v26  ;;  %v3012_v41 = vpop.permute.xlu1 %1374  ;;  %v1181_v26 = vld [vmem:[#allocation4 + $0x20] sm:$0xff] }
 0x4bc   : > { %v999_v13 = vpop.permute.xlu0 %998 }
 0x4bd   : > { %2208 = vmatpush3.msra.mxu0 %v999_v13 }
 0x4be   : > { %2210 = vmatmul.mubr.msk.f32.vlgmr.msra.gmra.mxu0 %vm399_vm3, %v2361_v57  ;;  %2217 = vmatprep.subr.mxu0 %v2565_v0 }
 0x4bf   : > { %2218 = vmatpush3.msra.mxu0 %v1189_v62  ;;  %2219 = vmatprep.mubr.msk.f32.mxu0 %vm2566_vm1, %v2565_v0 }
 0x4c0   : > { %v1379_v56 = vpop.permute.xlu0 %1378  ;;  %2227 = vmatprep.subr.mxu0 %v2565_v0 }
 0x4c2   : > { %v2365_v60 = vpop.eup %2364 }
 0x4c3   : > { %2220 = vmatmul.mubr.msk.f32.vlgmr.msra.gmra.mxu0 %vm399_vm3, %v2365_v60  ;;  %v1175_v14 = vsel %vm399_vm3, %v2365_v60, 0.0  ;;  %v2367_v15 = vpop.eup %2366 }
 0x4c4   : > { %1176 = vadd.xlane.f32.xlu1 %v1175_v14  ;;  %2228 = vmatpush3.msra.mxu0 %v1379_v56  ;;  %v1569_v16 = vpop.permute.xlu0 %1568  ;;  %v1745_v19 = vsel %vm399_vm3, %v2367_v15, 0.0 }
 0x4c5   : > { %2229 = vmatprep.mubr.msk.f32.mxu0 %vm2566_vm1, %v2565_v0  ;;  %2237 = vmatprep.subr.mxu0 %v2565_v0 }
 0x4c6   : > { %v2369_v17 = vpop.eup %2368 }
 0x4c7   : > { %2230 = vmatmul.mubr.msk.f32.vlgmr.msra.gmra.mxu0 %vm399_vm3, %v2363_v12  ;;  %v1555_v18 = vsel %vm399_vm3, %v2369_v17, 0.0  ;;  %v2371_v32 = vpop.eup %2370 }
 0x4c8   : > { %1556 = vadd.xlane.f32.xlu0 %v1555_v18  ;;  %1746 = vadd.xlane.f32.xlu1 %v1745_v19  ;;  %v1759_v20 = vpop.permute.xlu0 %1758  ;;  %v2373_v35 = vpop.eup %2372  ;;  %v1174_v4 = vmul.f32 %v2371_v32, %v1173_v3 }
 0x4c9   : > { %2238 = vmatpush3.msra.mxu0 %v1569_v16  ;;  %2239 = vmatprep.mubr.msk.f32.mxu0 %vm2566_vm1, %v2565_v0  ;;  %v1554_v11 = vmul.f32 %v2373_v35, %v1553_v6 }
 0x4ca   : > { %2247 = vmatprep.subr.mxu0 %v2565_v0 }
 0x4cb   : > { %2240 = vmatmul.mubr.msk.f32.vlgmr.msra.gmra.mxu0 %vm399_vm3, %v2369_v17 }
 0x4cc   : > { %2248 = vmatpush3.msra.mxu0 %v1759_v20  ;;  %2249 = vmatprep.mubr.msk.f32.mxu0 %vm2566_vm1, %v2565_v0  ;;  %v1732_v0 = vmul.f32 1.442695, %v1731_v45 }
 0x4ce   : > { %2374 = vpow2.f32 %v1732_v0 }
 0x4cf   : > { %v690_v25 = vpop.f32.mrf.mxu0  ;;  %2250 = vmatmul.mubr.msk.f32.vlgmr.msra.gmra.mxu0 %vm399_vm3, %v2367_v15  ;;  %2376 = vrcp.f32 %v1841_v34 }
 0x4d0   : > { %v694_v27 = vadd.f32 %v690_v25, %v616_v23  ;;  %v997_v23 = vmul.f32 %v3010_v36, %v991_v22 }
 0x4d1   : > { %v2191_v28 = vpop.f32.mrf.mxu0 }
 0x4d2   : > { %695 = vst.msk [vmem:[#allocation4 + $0x8] sm:$0xff] %vm308_vm0, %v694_v27 }
 0x4d3   : > { %v880_v30 = vpop.f32.mrf.mxu0 }
 0x4d4   : > { %v884_v31 = vadd.f32 %v880_v30, %v807_v29 }
 0x4d5   : > { %v2201_v33 = vpop.f32.mrf.mxu0 }
 0x4d6   : > { %885 = vst.msk [vmem:[#allocation4 + $0x10] sm:$0xff] %vm308_vm0, %v884_v31  ;;  %v1371_v33 = vld [vmem:[#allocation4 + $0x28] sm:$0xff] }
 0x4d9   : > { %v1849_v29 = vld [vmem:[#allocation4 + $0x8] sm:$0xff] }
 0x4db   : > { %v2375_v39 = vpop.eup %2374 }
 0x4dc   : > { %v2377_v40 = vpop.eup %2376  ;;  %v1744_v12 = vmul.f32 %v2375_v39, %v1743_v7 }
 0x4de   : > { %1184 = vperm.xlu0 %2342, %v2371_v32  }
 0x4e2   : > { %1564 = vperm.xlu0 %2342, %v2373_v35  }
 0x4e6   : > { %1754 = vperm.xlu0 %2342, %v2375_v39   ;;  %v1858_v39 = vld [vmem:[#allocation4 + $0x10] sm:$0xff] }
 0x4ea   : > { %1845 = vperm.xlu0 %2342, %v2377_v40   ;;  %v1377_v40 = vmul.f32 %v3012_v41, %v1371_v33 }
 0x4ed   : > { %v606_v43 = vpop.xlane.xlu1 %605 }
 0x4ee   : > { %v607_v45 = vadd.f32 %v606_v43, %v603_v42  ;;  %v1561_v42 = vld [vmem:[#allocation4 + $0x30] sm:$0xff] }
 0x4f0   : > { %608 = vst.msk [vmem:[#allocation3 + $0x8] sm:$0xff] %vm291_vm2, %v607_v45 }
 0x4f1   : > { %v797_v50 = vpop.xlane.xlu1 %796 }
 0x4f2   : > { %v798_v52 = vadd.f32 %v797_v50, %v794_v46 }
 0x4f4   : > { %799 = vst.msk [vmem:[#allocation3 + $0x10] sm:$0xff] %vm291_vm2, %v798_v52 }
 0x4f5   : > { %v987_v55 = vpop.xlane.xlu1 %986 }
 0x4f6   : > { %v988_v57 = vadd.f32 %v987_v55, %v984_v54  ;;  %v1751_v54 = vld [vmem:[#allocation4 + $0x38] sm:$0xff] }
 0x4f7   : > { %v1850_v59 = vld [vmem:[#allocation3 + $0x8] sm:$0xff] }
 0x4f8   : > { %989 = vst.msk [vmem:[#allocation3 + $0x18] sm:$0xff] %vm291_vm2, %v988_v57  ;;  %2378 = vrcp.f32 %v1850_v59 }
 0x4fb   : > { %v1859_v37 = vld [vmem:[#allocation3 + $0x10] sm:$0xff] }
 0x4fc   : > { %2380 = vrcp.f32 %v1859_v37 }
 0x4ff   : > { %v1868_v61 = vld [vmem:[#allocation3 + $0x18] sm:$0xff] }
 0x500   : > { %2382 = vrcp.f32 %v1868_v61 }
 0x505   : > { %v2379_v63 = vpop.eup %2378 }
 0x506   : > { %1854 = vperm.xlu0 %2342, %v2379_v63  }
 0x509   : > { %v2381_v48 = vpop.eup %2380 }
 0x50a   : > { %1863 = vperm.xlu0 %2342, %v2381_v48  }
 0x50d   : > { %v2383_v1 = vpop.eup %2382 }
 0x50e   : > { %1872 = vperm.xlu0 %2342, %v2383_v1  }
 0x544   : > { %v1367_v47 = vpop.xlane.xlu0 %1366 }
 0x545   : > { %v1368_v53 = vadd.f32 %v1367_v47, %v1364_v2 }
 0x547   : > { %1369 = vst.msk [vmem:[#allocation3 + $0x28] sm:$0xff] %vm291_vm2, %v1368_v53 }
 0x54d   : > { %v1177_v5 = vpop.xlane.xlu1 %1176 }
 0x54e   : > { %v1178_v8 = vadd.f32 %v1177_v5, %v1174_v4  ;;  %v1886_v10 = vld [vmem:[#allocation3 + $0x28] sm:$0xff] }
 0x54f   : > { %2384 = vrcp.f32 %v1886_v10 }
 0x550   : > { %1179 = vst.msk [vmem:[#allocation3 + $0x20] sm:$0xff] %vm291_vm2, %v1178_v8 }
 0x551   : > { %v1557_v58 = vpop.xlane.xlu0 %1556  ;;  %v1747_v13 = vpop.xlane.xlu1 %1746 }
 0x552   : > { %v1558_v62 = vadd.f32 %v1557_v58, %v1554_v11  ;;  %v1748_v49 = vadd.f32 %v1747_v13, %v1744_v12  ;;  %v1840_v12 = vld [vmem:[#allocation4] sm:$0xff] }
 0x554   : > { %1559 = vst.msk [vmem:[#allocation3 + $0x30] sm:$0xff] %vm291_vm2, %v1558_v62  ;;  %1749 = vst.msk [vmem:[#allocation3 + $0x38] sm:$0xff] %vm291_vm2, %v1748_v49 }
 0x557   : > { %v1877_v56 = vld [vmem:[#allocation3 + $0x20] sm:$0xff] }
 0x558   : > { %2386 = vrcp.f32 %v1877_v56 }
 0x559   : > { %v1185_v18 = vpop.permute.xlu0 %1184 }
 0x55a   : > { %v1187_v0 = vmul.f32 %v1185_v18, %v1181_v26 }
 0x55b   : > { %v1895_v60 = vld [vmem:[#allocation3 + $0x30] sm:$0xff]  ;;  %v1904_v15 = vld [vmem:[#allocation3 + $0x38] sm:$0xff] }
 0x55c   : > { %v2385_v14 = vpop.eup %2384  ;;  %2388 = vrcp.f32 %v1895_v60 }
 0x55d   : > { %1890 = vperm.xlu0 %2342, %v2385_v14   ;;  %2390 = vrcp.f32 %v1904_v15  ;;  %v1565_v20 = vpop.permute.xlu0 %1564 }
 0x55e   : > { %v1567_v51 = vmul.f32 %v1565_v20, %v1561_v42 }
 0x561   : > { %v1755_v21 = vpop.permute.xlu0 %1754 }
 0x562   : > { %v1757_v59 = vmul.f32 %v1755_v21, %v1751_v54 }
 0x565   : > { %v2387_v16 = vpop.eup %2386  ;;  %v3026_v24 = vpop.permute.xlu0 %1845 }
 0x566   : > { %1881 = vperm.xlu1 %2343, %v2387_v16   ;;  %v1848_v58 = vmul.f32 %v3026_v24, %v1840_v12 }
 0x569   : > { %v2389_v17 = vpop.eup %2388 }
 0x56a   : > { %1899 = vperm.xlu0 %2342, %v2389_v17   ;;  %v2391_v19 = vpop.eup %2390 }
 0x56e   : > { %1908 = vperm.xlu0 %2342, %v2391_v19  }
 0x57e   : > { %v1070_v25 = vpop.f32.mrf.mxu0 }
 0x57f   : > { %v1074_v27 = vadd.f32 %v1070_v25, %v997_v23 }
 0x580   : > { %v2211_v28 = vpop.f32.mrf.mxu0 }
 0x581   : > { %1075 = vst.msk [vmem:[#allocation4 + $0x18] sm:$0xff] %vm308_vm0, %v1074_v27  ;;  %v1855_v30 = vpop.permute.xlu0 %1854 }
 0x582   : > { %v1857_v31 = vmul.f32 %v1855_v30, %v1849_v29 }
 0x583   : > { %v1260_v34 = vpop.f32.mrf.mxu0 }
 0x584   : > { %v1264_v32 = vadd.f32 %v1260_v34, %v1187_v0  ;;  %1913 = vrot.lane.b32.xlu0 %v1857_v31, %s2576_s22 }
 0x585   : > { %v2221_v35 = vpop.f32.mrf.mxu0  ;;  %v1864_v36 = vpop.permute.xlu0 %1863 }
 0x586   : > { %1265 = vst.msk [vmem:[#allocation4 + $0x20] sm:$0xff] %vm308_vm0, %v1264_v32  ;;  %v1866_v38 = vmul.f32 %v1864_v36, %v1858_v39 }
 0x587   : > { %v1450_v43 = vpop.f32.mrf.mxu0 }
 0x588   : > { %v1454_v44 = vadd.f32 %v1450_v43, %v1377_v40  ;;  %1917 = vrot.lane.b32.xlu1 %v1866_v38, %s2577_s16  ;;  %v1867_v45 = vld [vmem:[#allocation4 + $0x18] sm:$0xff] }
 0x589   : > { %v2231_v46 = vpop.f32.mrf.mxu0  ;;  %v1873_v50 = vpop.permute.xlu0 %1872 }
 0x58a   : > { %1455 = vst.msk [vmem:[#allocation4 + $0x28] sm:$0xff] %vm308_vm0, %v1454_v44  ;;  %v1875_v52 = vmul.f32 %v1873_v50, %v1867_v45 }
 0x58b   : > { %v1640_v55 = vpop.f32.mrf.mxu0 }
 0x58c   : > { %v1644_v57 = vadd.f32 %v1640_v55, %v1567_v51  ;;  %1921 = vrot.lane.b32.xlu0 %v1875_v52, %s2578_s23 }
 0x58d   : > { %v2241_v41 = vpop.f32.mrf.mxu0  ;;  %v1876_v2 = vld [vmem:[#allocation4 + $0x20] sm:$0xff] }
 0x58e   : > { %1645 = vst.msk [vmem:[#allocation4 + $0x30] sm:$0xff] %vm308_vm0, %v1644_v57 }
 0x58f   : > { %v1830_v37 = vpop.f32.mrf.mxu0 }
 0x590   : > { %v1834_v61 = vadd.f32 %v1830_v37, %v1757_v59 }
 0x591   : > { %v2251_v63 = vpop.f32.mrf.mxu0  ;;  %v1885_v48 = vld [vmem:[#allocation4 + $0x28] sm:$0xff] }
 0x592   : > { %1835 = vst.msk [vmem:[#allocation4 + $0x38] sm:$0xff] %vm308_vm0, %v1834_v61 }
 0x595   : > { %v1894_v3 = vld [vmem:[#allocation4 + $0x30] sm:$0xff] }
 0x599   : > { %v1903_v6 = vld [vmem:[#allocation4 + $0x38] sm:$0xff] }
 0x5d8   : > { %v1891_v1 = vpop.permute.xlu0 %1890 }
 0x5d9   : > { %v1893_v9 = vmul.f32 %v1891_v1, %v1885_v48 }
 0x5db   : > { %1929 = vrot.lane.b32.xlu0 %v1893_v9, %s2579_s20 }
 0x5e1   : > { %v1882_v47 = vpop.permute.xlu1 %1881 }
 0x5e2   : > { %v1884_v53 = vmul.f32 %v1882_v47, %v1876_v2 }
 0x5e4   : > { %1925 = vrot.lane.b32.xlu1 %v1884_v53, %s2580_s29 }
 0x5e5   : > { %v1900_v4 = vpop.permute.xlu0 %1899 }
 0x5e6   : > { %v1902_v5 = vmul.f32 %v1900_v4, %v1894_v3 }
 0x5e8   : > { %1933 = vrot.lane.b32.xlu1 %v1902_v5, %s2581_s4 }
 0x5e9   : > { %v1909_v7 = vpop.permute.xlu0 %1908 }
 0x5ea   : > { %v1911_v8 = vmul.f32 %v1909_v7, %v1903_v6 }
 0x5ec   : > { %1937 = vrot.lane.b32.xlu0 %v1911_v8, %s2582_s8 }
 0x5f6   : > { %v1914_v10 = vpop.permute.xlu0 %1913 }
 0x5f7   : > { %v1940_v49 = vsel %vm308_vm0, %v1848_v58, %v1914_v10 }
 0x5fa   : > { %v1918_v11 = vpop.permute.xlu1 %1917 }
 0x5fb   : > { %v1941_v56 = vsel %vm399_vm3, %v1940_v49, %v1918_v11 }
 0x5fe   : > { %v1922_v13 = vpop.permute.xlu0 %1921 }
 0x5ff   : > { %v1943_v60 = vsel %vm1942_vm4, %v1941_v56, %v1922_v13 }
 0x64d   : > { %v1930_v14 = vpop.permute.xlu0 %1929 }
 0x656   : > { %v1926_v62 = vpop.permute.xlu1 %1925 }
 0x657   : > { %v1945_v15 = vsel %vm1944_vm5, %v1943_v60, %v1926_v62 }
 0x658   : > { %v1947_v17 = vsel %vm1946_vm6, %v1945_v15, %v1930_v14 }
 0x65a   : > { %v1934_v16 = vpop.permute.xlu1 %1933 }
 0x65b   : > { %v1949_v18 = vsel %vm1948_vm7, %v1947_v17, %v1934_v16 }
 0x65e   : > { %v1938_v19 = vpop.permute.xlu0 %1937 }
 0x65f   : > { %v1951_v20 = vsel %vm1950_vm8, %v1949_v18, %v1938_v19 }
 0x660   : > { %1953 = vst.msk [vmem:[%s286_s30] sm:$0xff] %vm1952_vm9, %v1951_v20 }
 0x661   : > { %2489 = shalt.err (!%p2486_p12)
}
 0x662   : > { %s2490_s7 = scalar_lea.hbm %s3042_s5, 128  ;;  %s2494_s22 = scalar_lea.hbm %s3087_s3, 256 }
 0x663   : > { %p2491_p1 = scmp.ne.s32.totalorder %s3042_s5, %s2490_s7  ;;  %p2495_p6 = scmp.lt.s32.totalorder %s3042_s5, %s3087_s3 }
 0x664   : > { %p2496_p7 = scmp.lt.s32.totalorder %s2494_s22, %s2490_s7 }
 0x665   : > { %p2492_p2 = pnand %p2491_p1, %p2659_p9 }
 0x666   : > { %p2497_p8 = por %p2496_p7, %p2495_p6 }
 0x667   : > { %p2493_p5 = pneg %p2492_p2 }
 0x669   : > { %p2498_p0 = pnand %p2497_p8, %p2493_p5 }
 0x66b   : > { %2501 = shalt.err (!%p2498_p0)
}
 0x66c   : > { %2258 = dma.vmem_to_hbm [thread:$0]  (%p2659_p9), %s1970_s11, 128, %s3042_s5, %s1955_s10  }
 0x66d PF: > { %s1981_s20 = sand.u32 1, %s2540_s12   ;;  %p3102_p3 = scmp.ge.s32.totalorder %s2560_s17, 2 }
 0x66e   : > { %s1982_s29 = scalar_lea.sflag [#allocation7], %s1981_s20 }
 0x66f   : > { %p2271_p4 = pnand %p3102_p3, %p2666_p11 }
 0x671   : > { %p2272_p10 = pneg %p2271_p4 }
 0x673   : > { %2535 = dma.done.wait (%p2272_p10), %s1982_s29, 128  }
 0x674   : > { %2537 = vsyncadd (%p2272_p10), %s1982_s29, 4294967168  ;;  %s22_s17 = sadd.s32 1, %s2560_s17   ;;  %s3103_s15 = sld [smem:[#allocation15_spill]] }
 0x675   : > { %p19_p13 = scmp.ge.s32.totalorder %s22_s17, 4   ;;  %s3104_s16 = sld [smem:[#allocation16_spill]] }
 0x676   : > { %s3105_s12 = smov %s2544_s13  ;;  %s3106_s13 = smov %s2548_s14 }
 0x677   : > { %s3107_s14 = smov %s2664_s26  ;;  %21 = sbr.rel (!%p19_p13) target bundleno = 10 (0xa), region = 130 }
 0x67c   :  { %1987 = vsyncpa [#allocation6], 1 }
 0x67d   :  { %1989 = vsyncpa [#allocation6 + $0x1], 1 }
 0x67e   :  { %1990 = vsyncpa [#allocation9], 1 }
 0x67f   :  { %1992 = vsyncpa [#allocation9 + $0x1], 1 }
 0x680   :  { %1993 = vsyncpa [#allocation7], 1 }
 0x681   :  { %1995 = vsyncpa [#allocation7 + $0x1], 1 }

</bundles_post_ra>
